<compile_context>
chip_gen: v6e
topology: v6e:2x2x1
jax: 0.10.0
libtpu: 0.0.40
codegen_flags: <defaults>
</compile_context>

<pallas_src>
import math
import functools

import jax
import jax.numpy as jnp
from jax.experimental import pallas as pl
from jax.experimental.pallas import tpu as pltpu


# --------------------------------- kernels ----------------------------------

def _encoder_stack_kernel(x_ref, pe_ref,
                          wqkv_ref, bqkv_ref, wo_ref, bo_ref,
                          g1_ref, be1_ref,
                          w1_ref, b1_ref, w2_ref, b2_ref,
                          g2_ref, be2_ref,
                          o_ref, *, nhead, scale, mxu_dtype, eps=1e-5):
    """One grid step = one (batch-tile, layer) pair of a post-norm encoder layer."""
    l = pl.program_id(1)

    @pl.when(l == 0)
    def _():
        # fused "embedding * sqrt(d_model) + positional encoding" (dropout = identity)
        o_ref[...] = x_ref[...] * scale + pe_ref[...][None, :, :]

    x = o_ref[...]                                  # (bt, S, D), VMEM-resident across layers
    B, S, D = x.shape
    hd = D // nhead
    BS = B * S

    def mxu(a, b):
        # cast only at the MXU boundary; accumulate in f32
        return jnp.dot(a.astype(mxu_dtype), b.astype(mxu_dtype),
                       preferred_element_type=jnp.float32)

    def layer_norm(v, g, b):
        mu = jnp.mean(v, axis=-1, keepdims=True)
        var = jnp.mean((v - mu) ** 2, axis=-1, keepdims=True)
        return (v - mu) * jax.lax.rsqrt(var + eps) * g + b

    # ---- multi-head self-attention -----------------------------------------
    # fused QKV projection: one (BS, D) @ (D, 3D) matmul + bias
    qkv = mxu(x.reshape(BS, D), wqkv_ref[0]) + bqkv_ref[0, 0]
    inv_sqrt_hd = 1.0 / math.sqrt(hd)
    q = qkv[:, :D].reshape(B, S, D) * inv_sqrt_hd   # 1/sqrt(hd) folded into q
    k = qkv[:, D:2 * D].reshape(B, S, D)
    v = qkv[:, 2 * D:].reshape(B, S, D)

    wo = wo_ref[0]                                   # (D, D)
    attn = None
    # static head loop; each head is a batched (over the batch tile) 3-D einsum,
    # and the output projection is accumulated per head
    # (concat_h(attn_h) @ Wo == sum_h attn_h @ Wo[h*hd:(h+1)*hd, :]) so there is
    # no lane-dim concatenate of head outputs.
    for h in range(nhead):
        sl = slice(h * hd, (h + 1) * hd)
        s = jnp.einsum('bqd,bkd->bqk',
                       q[:, :, sl].astype(mxu_dtype), k[:, :, sl].astype(mxu_dtype),
                       preferred_element_type=jnp.float32)
        s = s - jnp.max(s, axis=-1, keepdims=True)
        p = jnp.exp(s)
        p = p * pl.reciprocal(jnp.sum(p, axis=-1, keepdims=True), approx=True)
        oh = jnp.einsum('bqk,bkd->bqd',
                        p.astype(mxu_dtype), v[:, :, sl].astype(mxu_dtype),
                        preferred_element_type=jnp.float32)
        ph = mxu(oh.reshape(BS, hd), wo[sl, :])
        attn = ph if attn is None else attn + ph
    attn = attn + bo_ref[0, 0]                       # (BS, D)

    y = layer_norm(x + attn.reshape(B, S, D), g1_ref[0, 0], be1_ref[0, 0])

    # ---- feed-forward (ReLU) ------------------------------------------------
    ff = mxu(y.reshape(BS, D), w1_ref[0]) + b1_ref[0, 0]
    ff = jnp.maximum(ff, 0.0)
    ff = mxu(ff, w2_ref[0]) + b2_ref[0, 0]

    o_ref[...] = layer_norm(y + ff.reshape(B, S, D), g2_ref[0, 0], be2_ref[0, 0])


def _decoder_kernel(x_ref, w_ref, b_ref, o_ref, *, mxu_dtype):
    # tiled final Linear(dim_word -> num_of_vocab): (tm, D) @ (D, tn) + bias
    o_ref[...] = jnp.dot(x_ref[...].astype(mxu_dtype), w_ref[...].astype(mxu_dtype),
                         preferred_element_type=jnp.float32) + b_ref[...]


# ------------------------------ parameters ----------------------------------

def init_params(key, *, vocab, d_model, nhead, nlayers, d_hidden, max_len=64):
    del nhead  # head count does not affect parameter shapes
    keys = jax.random.split(key, 3 + nlayers)
    initrange = 0.1
    emb = jax.random.uniform(keys[0], (vocab, d_model), jnp.float32, -initrange, initrange)
    wdec = jax.random.uniform(keys[1], (d_model, vocab), jnp.float32, -initrange, initrange)
    bdec = jnp.zeros((1, vocab), jnp.float32)

    def u(k, shape, lo=-0.1, hi=0.1):
        return jax.random.uniform(k, shape, jnp.float32, lo, hi)

    names = ('wqkv', 'bqkv', 'wo', 'bo', 'g1', 'be1',
             'w1', 'b1', 'w2', 'b2', 'g2', 'be2')
    per = {n: [] for n in names}
    for i in range(nlayers):
        lk = jax.random.split(keys[3 + i], 12)
        per['wqkv'].append(u(lk[0], (d_model, 3 * d_model)))
        per['bqkv'].append(u(lk[1], (1, 3 * d_model)))
        per['wo'].append(u(lk[2], (d_model, d_model)))
        per['bo'].append(u(lk[3], (1, d_model)))
        per['g1'].append(1.0 + 0.1 * u(lk[4], (1, d_model)))
        per['be1'].append(0.1 * u(lk[5], (1, d_model)))
        per['w1'].append(u(lk[6], (d_model, d_hidden)))
        per['b1'].append(u(lk[7], (1, d_hidden)))
        per['w2'].append(u(lk[8], (d_hidden, d_model)))
        per['b2'].append(u(lk[9], (1, d_model)))
        per['g2'].append(1.0 + 0.1 * u(lk[10], (1, d_model)))
        per['be2'].append(0.1 * u(lk[11], (1, d_model)))
    stacked = {n: jnp.stack(v) for n, v in per.items()}   # leading (L) axis

    # sinusoidal positional-encoding table (standard tutorial PositionalEncoding)
    position = jnp.arange(max_len, dtype=jnp.float32)[:, None]
    div_term = jnp.exp(jnp.arange(0, d_model, 2, dtype=jnp.float32)
                       * (-math.log(10000.0) / d_model))
    pe = jnp.zeros((max_len, d_model), jnp.float32)
    pe = pe.at[:, 0::2].set(jnp.sin(position * div_term))
    pe = pe.at[:, 1::2].set(jnp.cos(position * div_term))

    return dict(emb=emb, wdec=wdec, bdec=bdec, pe=pe, **stacked)


# ------------------------------ forward pass ---------------------------------

def transformer_forward(tokens, params, *, nhead, mxu_dtype=jnp.float32):
    """tokens: (S, B) int32 — same convention as the PyTorch module's `src`."""
    S, B = tokens.shape
    D = params['emb'].shape[1]
    V = params['wdec'].shape[1]
    F = params['w1'].shape[2]
    L = params['wqkv'].shape[0]

    # TODO(synk): embedding gather is data-dependent row lookup; left to XLA
    # (could be moved in-kernel with scalar-prefetch + pl.Element row gather).
    emb = jnp.take(params['emb'], tokens, axis=0)        # (S, B, D)
    x = jnp.transpose(emb, (1, 0, 2))                    # (B, S, D)
    pe = params['pe'][:S]                                # (S, D)

    # batch tiles: 2-way split feeds v7x's two TensorCores; harmless elsewhere
    bt = max(1, (B + 1) // 2)
    nb = pl.cdiv(B, bt)

    act_spec = pl.BlockSpec((bt, S, D), lambda b, l: (b, 0, 0))
    pe_spec = pl.BlockSpec((S, D), lambda b, l: (0, 0))

    def wspec(d1, d2):   # stacked per-layer parameter, selected by layer index
        return pl.BlockSpec((1, d1, d2), lambda b, l: (l, 0, 0))

    w_bytes = 4 * L * (4 * D * D + 2 * D * F + 9 * D + F)
    enc_cost = pl.CostEstimate(
        flops=int(2 * L * B * S * (4 * D * D + 2 * S * D + 2 * D * F)),
        transcendentals=int(L * B * nhead * S * S + 2 * L * B * S),
        bytes_accessed=int(4 * (2 * B * S * D + S * D) + nb * w_bytes),
    )

    x = pl.pallas_call(
        functools.partial(_encoder_stack_kernel, nhead=nhead,
                          scale=math.sqrt(D), mxu_dtype=mxu_dtype),
        grid=(nb, L),
        out_shape=jax.ShapeDtypeStruct((B, S, D), jnp.float32),
        in_specs=[act_spec, pe_spec,
                  wspec(D, 3 * D), wspec(1, 3 * D),     # wqkv, bqkv
                  wspec(D, D), wspec(1, D),             # wo, bo
                  wspec(1, D), wspec(1, D),             # g1, be1
                  wspec(D, F), wspec(1, F),             # w1, b1
                  wspec(F, D), wspec(1, D),             # w2, b2
                  wspec(1, D), wspec(1, D)],            # g2, be2
        out_specs=pl.BlockSpec((bt, S, D), lambda b, l: (b, 0, 0)),
        compiler_params=pltpu.CompilerParams(
            dimension_semantics=("parallel", "arbitrary")),
        cost_estimate=enc_cost,
    )(x, pe, params['wqkv'], params['bqkv'], params['wo'], params['bo'],
      params['g1'], params['be1'], params['w1'], params['b1'],
      params['w2'], params['b2'], params['g2'], params['be2'])

    # ---- tiled vocab projection (lane-dense output tiles) -------------------
    BS = B * S
    x2 = x.reshape(BS, D)
    tm = BS if BS <= 256 else 256           # 256-row tiles (MXU M dim) for big inputs
    tn = V if V <= 256 else 256             # 256 = multiple of 128 lanes for big vocab
    dec_cost = pl.CostEstimate(
        flops=int(2 * BS * D * V), transcendentals=0,
        bytes_accessed=int(4 * (BS * D + D * V + V + BS * V)),
    )
    logits2 = pl.pallas_call(
        functools.partial(_decoder_kernel, mxu_dtype=mxu_dtype),
        grid=(pl.cdiv(BS, tm), pl.cdiv(V, tn)),
        out_shape=jax.ShapeDtypeStruct((BS, V), jnp.float32),
        in_specs=[pl.BlockSpec((tm, D), lambda i, j: (i, 0)),
                  pl.BlockSpec((D, tn), lambda i, j: (0, j)),
                  pl.BlockSpec((1, tn), lambda i, j: (0, j))],
        out_specs=pl.BlockSpec((tm, tn), lambda i, j: (i, j)),
        compiler_params=pltpu.CompilerParams(
            dimension_semantics=("parallel", "parallel")),
        cost_estimate=dec_cost,
    )(x2, params['wdec'], params['bdec'])

    logits = logits2.reshape(B, S, V)
    return jnp.transpose(logits, (1, 0, 2))              # (S, B, V) like PyTorch


# ------------------------- pure-JAX reference check --------------------------

def reference_forward(tokens, params, *, nhead):
    S, B = tokens.shape
    D = params['emb'].shape[1]
    hd = D // nhead
    L = params['wqkv'].shape[0]

    x = jnp.take(params['emb'], tokens, axis=0) * math.sqrt(D)    # (S, B, D)
    x = x + params['pe'][:S][:, None, :]
    x = jnp.transpose(x, (1, 0, 2))                               # (B, S, D)

    def ln(v, g, b, eps=1e-5):
        mu = v.mean(-1, keepdims=True)
        var = ((v - mu) ** 2).mean(-1, keepdims=True)
        return (v - mu) / jnp.sqrt(var + eps) * g + b

    for l in range(L):
        qkv = x @ params['wqkv'][l] + params['bqkv'][l, 0]
        q, k, v = jnp.split(qkv, 3, axis=-1)

        def split(t):
            return t.reshape(B, S, nhead, hd).transpose(0, 2, 1, 3)

        qh, kh, vh = split(q), split(k), split(v)
        s = jnp.einsum('bhqd,bhkd->bhqk', qh, kh) / math.sqrt(hd)
        p = jax.nn.softmax(s, axis=-1)
        a = jnp.einsum('bhqk,bhkd->bhqd', p, vh).transpose(0, 2, 1, 3).reshape(B, S, D)
        a = a @ params['wo'][l] + params['bo'][l, 0]
        x = ln(x + a, params['g1'][l, 0], params['be1'][l, 0])
        ff = jnp.maximum(x @ params['w1'][l] + params['b1'][l, 0], 0.0)
        ff = ff @ params['w2'][l] + params['b2'][l, 0]
        x = ln(x + ff, params['g2'][l, 0], params['be2'][l, 0])

    logits = x @ params['wdec'] + params['bdec']
    return jnp.transpose(logits, (1, 0, 2))


# ----------------------------------- main ------------------------------------

if __name__ == "__main__":
    VOCAB, D_MODEL, NHEAD, NLAYERS, D_HIDDEN = 32, 32, 4, 2, 64
    S, B = 8, 2

    key = jax.random.PRNGKey(0)
    pkey, tkey = jax.random.split(key)
    params = init_params(pkey, vocab=VOCAB, d_model=D_MODEL, nhead=NHEAD,
                         nlayers=NLAYERS, d_hidden=D_HIDDEN)
    tokens = jax.random.randint(tkey, (S, B), 0, VOCAB, dtype=jnp.int32)

    ref = jax.block_until_ready(reference_forward(tokens, params, nhead=NHEAD))

    # f32-MXU path: tight check against the pure-JAX reference
    out = jax.block_until_ready(transformer_forward(tokens, params, nhead=NHEAD))
    assert out.shape == (S, B, VOCAB), out.shape
    diff = float(jnp.max(jnp.abs(out - ref)))
    assert diff < 2e-2, f"f32 kernel mismatch vs reference: {diff}"

    # bf16-at-MXU-inputs path (f32 accumulation / LayerNorm / softmax): looser check
    out_bf16 = jax.block_until_ready(
        transformer_forward(tokens, params, nhead=NHEAD, mxu_dtype=jnp.bfloat16))
    diff_bf16 = float(jnp.max(jnp.abs(out_bf16 - ref)))
    assert diff_bf16 < 1e-1, f"bf16 kernel mismatch vs reference: {diff_bf16}"

    print("KERNEL_OK")
</pallas_src>

<mosaic_0001>
module attributes {stable_mosaic.version = 11 : i64} {
  func.func @_encoder_stack_kernel(%arg0: i32, %arg1: i32, %arg2: memref<1x8x32xf32, #tpu.memory_space<vmem>>, %arg3: memref<8x32xf32, #tpu.memory_space<vmem>>, %arg4: memref<1x32x96xf32, #tpu.memory_space<vmem>>, %arg5: memref<1x1x96xf32, #tpu.memory_space<vmem>>, %arg6: memref<1x32x32xf32, #tpu.memory_space<vmem>>, %arg7: memref<1x1x32xf32, #tpu.memory_space<vmem>>, %arg8: memref<1x1x32xf32, #tpu.memory_space<vmem>>, %arg9: memref<1x1x32xf32, #tpu.memory_space<vmem>>, %arg10: memref<1x32x64xf32, #tpu.memory_space<vmem>>, %arg11: memref<1x1x64xf32, #tpu.memory_space<vmem>>, %arg12: memref<1x64x32xf32, #tpu.memory_space<vmem>>, %arg13: memref<1x1x32xf32, #tpu.memory_space<vmem>>, %arg14: memref<1x1x32xf32, #tpu.memory_space<vmem>>, %arg15: memref<1x1x32xf32, #tpu.memory_space<vmem>>, %arg16: memref<1x8x32xf32, #tpu.memory_space<vmem>>) attributes {dimension_semantics = [#tpu.dimension_semantics<parallel>, #tpu.dimension_semantics<arbitrary>], iteration_bounds = array<i64: 2, 2>, scalar_prefetch = 0 : i64, scratch_operands = 0 : i64, tpu.core_type = #tpu.core_type<tc>, window_params = [{transform_indices = @transform_0, window_bounds = array<i64: 1, 8, 32>}, {pipeline_mode = #tpu.pipeline_mode<synchronous>, transform_indices = @transform_1, window_bounds = array<i64: 8, 32>}, {transform_indices = @transform_2, window_bounds = array<i64: 1, 32, 96>}, {transform_indices = @transform_3, window_bounds = array<i64: 1, 1, 96>}, {transform_indices = @transform_4, window_bounds = array<i64: 1, 32, 32>}, {transform_indices = @transform_5, window_bounds = array<i64: 1, 1, 32>}, {transform_indices = @transform_6, window_bounds = array<i64: 1, 1, 32>}, {transform_indices = @transform_7, window_bounds = array<i64: 1, 1, 32>}, {transform_indices = @transform_8, window_bounds = array<i64: 1, 32, 64>}, {transform_indices = @transform_9, window_bounds = array<i64: 1, 1, 64>}, {transform_indices = @transform_10, window_bounds = array<i64: 1, 64, 32>}, {transform_indices = @transform_11, window_bounds = array<i64: 1, 1, 32>}, {transform_indices = @transform_12, window_bounds = array<i64: 1, 1, 32>}, {transform_indices = @transform_13, window_bounds = array<i64: 1, 1, 32>}, {transform_indices = @transform_14, window_bounds = array<i64: 1, 8, 32>}]} {
    %c0_i32 = arith.constant 0 : i32
    %0 = arith.cmpi eq, %arg1, %c0_i32 : i32
    %1 = arith.extui %0 : i1 to i32
    %c0_i32_0 = arith.constant 0 : i32
    %2 = arith.cmpi ne, %1, %c0_i32_0 : i32
    scf.if %2 {
      %c0_76 = arith.constant 0 : index
      %c0_77 = arith.constant 0 : index
      %c0_78 = arith.constant 0 : index
      %183 = vector.load %arg2[%c0_76, %c0_77, %c0_78] : memref<1x8x32xf32, #tpu.memory_space<vmem>>, vector<1x8x32xf32>
      %cst_79 = arith.constant 5.65685415 : f32
      %184 = vector.broadcast %cst_79 : f32 to vector<1x8x32xf32>
      %185 = arith.mulf %183, %184 : vector<1x8x32xf32>
      %c0_80 = arith.constant 0 : index
      %c0_81 = arith.constant 0 : index
      %186 = vector.load %arg3[%c0_80, %c0_81] : memref<8x32xf32, #tpu.memory_space<vmem>>, vector<8x32xf32>
      %187 = vector.shape_cast %186 : vector<8x32xf32> to vector<1x8x32xf32>
      %188 = arith.addf %185, %187 : vector<1x8x32xf32>
      %c0_82 = arith.constant 0 : index
      %c0_83 = arith.constant 0 : index
      %c0_84 = arith.constant 0 : index
      %189 = vector.load %arg16[%c0_82, %c0_83, %c0_84] : memref<1x8x32xf32, #tpu.memory_space<vmem>>, vector<1x8x32xf32>
      tpu.vector_store %arg16[%c0_82, %c0_83, %c0_84], %188 {strides = array<i32>} : memref<1x8x32xf32, #tpu.memory_space<vmem>>, vector<1x8x32xf32>,
    } else {
    }
    %c0 = arith.constant 0 : index
    %c0_1 = arith.constant 0 : index
    %c0_2 = arith.constant 0 : index
    %3 = vector.load %arg16[%c0, %c0_1, %c0_2] : memref<1x8x32xf32, #tpu.memory_space<vmem>>, vector<1x8x32xf32>
    %4 = vector.shape_cast %3 : vector<1x8x32xf32> to vector<8x32xf32>
    %c0_3 = arith.constant 0 : index
    %c0_4 = arith.constant 0 : index
    %c0_5 = arith.constant 0 : index
    %5 = vector.load %arg4[%c0_3, %c0_4, %c0_5] : memref<1x32x96xf32, #tpu.memory_space<vmem>>, vector<1x32x96xf32>
    %6 = vector.shape_cast %5 : vector<1x32x96xf32> to vector<32x96xf32>
    %cst = arith.constant dense<0.000000e+00> : vector<8x96xf32>
    %7 = tpu.matmul %4, %6, %cst {dimension_numbers = #tpu.dot_dimension_numbers<[1], [0], [0], [1], [0, 0, 1, 1], [], []>} : vector<8x32xf32>, vector<32x96xf32>, vector<8x96xf32> -> vector<8x96xf32>
    %c0_6 = arith.constant 0 : index
    %c0_7 = arith.constant 0 : index
    %c0_8 = arith.constant 0 : index
    %8 = vector.load %arg5[%c0_6, %c0_7, %c0_8] : memref<1x1x96xf32, #tpu.memory_space<vmem>>, vector<1x1x96xf32>
    %9 = vector.shape_cast %8 : vector<1x1x96xf32> to vector<96xf32>
    %10 = vector.shape_cast %9 : vector<96xf32> to vector<1x96xf32>
    %11 = vector.broadcast %10 : vector<1x96xf32> to vector<8x96xf32>
    %12 = arith.addf %7, %11 : vector<8x96xf32>
    %13 = vector.extract_strided_slice %12 {offsets = [0, 0], sizes = [8, 32], strides = [1, 1]} : vector<8x96xf32> to vector<8x32xf32>
    %14 = vector.shape_cast %13 : vector<8x32xf32> to vector<1x8x32xf32>
    %cst_9 = arith.constant 0.353553385 : f32
    %15 = vector.broadcast %cst_9 : f32 to vector<1x8x32xf32>
    %16 = arith.mulf %14, %15 : vector<1x8x32xf32>
    %17 = vector.extract_strided_slice %12 {offsets = [0, 32], sizes = [8, 32], strides = [1, 1]} : vector<8x96xf32> to vector<8x32xf32>
    %18 = vector.shape_cast %17 : vector<8x32xf32> to vector<1x8x32xf32>
    %19 = vector.extract_strided_slice %12 {offsets = [0, 64], sizes = [8, 32], strides = [1, 1]} : vector<8x96xf32> to vector<8x32xf32>
    %20 = vector.shape_cast %19 : vector<8x32xf32> to vector<1x8x32xf32>
    %c0_10 = arith.constant 0 : index
    %c0_11 = arith.constant 0 : index
    %c0_12 = arith.constant 0 : index
    %21 = vector.load %arg6[%c0_10, %c0_11, %c0_12] : memref<1x32x32xf32, #tpu.memory_space<vmem>>, vector<1x32x32xf32>
    %22 = vector.shape_cast %21 : vector<1x32x32xf32> to vector<32x32xf32>
    %23 = vector.extract_strided_slice %16 {offsets = [0, 0, 0], sizes = [1, 8, 8], strides = [1, 1, 1]} : vector<1x8x32xf32> to vector<1x8x8xf32>
    %24 = vector.extract_strided_slice %18 {offsets = [0, 0, 0], sizes = [1, 8, 8], strides = [1, 1, 1]} : vector<1x8x32xf32> to vector<1x8x8xf32>
    "tpu.trace_start"() <{level = 10 : i32, message = "bqd,bkd->bqk"}> : () -> ()
    %cst_13 = arith.constant dense<0.000000e+00> : vector<1x8x8xf32>
    %25 = tpu.matmul %23, %24, %cst_13 {dimension_numbers = #tpu.dot_dimension_numbers<[2], [2], [1], [1], [0, 0, 0, 1, 1, 1], [0], [0]>} : vector<1x8x8xf32>, vector<1x8x8xf32>, vector<1x8x8xf32> -> vector<1x8x8xf32>
    "tpu.trace_stop"() : () -> ()
    %cst_14 = arith.constant dense<0xFF800000> : vector<1x8xf32>
    %26 = vector.multi_reduction <maximumf>, %25, %cst_14 [2] : vector<1x8x8xf32> to vector<1x8xf32>
    %27 = vector.shape_cast %26 : vector<1x8xf32> to vector<1x8x1xf32>
    %28 = vector.broadcast %27 : vector<1x8x1xf32> to vector<1x8x8xf32>
    %29 = arith.subf %25, %28 : vector<1x8x8xf32>
    %30 = math.exp %29 : vector<1x8x8xf32>
    %cst_15 = arith.constant dense<0.000000e+00> : vector<1x8xf32>
    %31 = vector.multi_reduction <add>, %30, %cst_15 [2] : vector<1x8x8xf32> to vector<1x8xf32>
    %32 = vector.shape_cast %31 : vector<1x8xf32> to vector<1x8x1xf32>
    %33 = tpu.reciprocal %32 {approx = true} : vector<1x8x1xf32> -> vector<1x8x1xf32>
    %34 = vector.broadcast %33 : vector<1x8x1xf32> to vector<1x8x8xf32>
    %35 = arith.mulf %30, %34 : vector<1x8x8xf32>
    %36 = vector.extract_strided_slice %20 {offsets = [0, 0, 0], sizes = [1, 8, 8], strides = [1, 1, 1]} : vector<1x8x32xf32> to vector<1x8x8xf32>
    "tpu.trace_start"() <{level = 10 : i32, message = "bqk,bkd->bqd"}> : () -> ()
    %cst_16 = arith.constant dense<0.000000e+00> : vector<1x8x8xf32>
    %37 = tpu.matmul %35, %36, %cst_16 {dimension_numbers = #tpu.dot_dimension_numbers<[2], [1], [1], [2], [0, 0, 0, 1, 1, 2], [0], [0]>} : vector<1x8x8xf32>, vector<1x8x8xf32>, vector<1x8x8xf32> -> vector<1x8x8xf32>
    "tpu.trace_stop"() : () -> ()
    %38 = vector.shape_cast %37 : vector<1x8x8xf32> to vector<8x8xf32>
    %39 = vector.extract_strided_slice %22 {offsets = [0, 0], sizes = [8, 32], strides = [1, 1]} : vector<32x32xf32> to vector<8x32xf32>
    %cst_17 = arith.constant dense<0.000000e+00> : vector<8x32xf32>
    %40 = tpu.matmul %38, %39, %cst_17 {dimension_numbers = #tpu.dot_dimension_numbers<[1], [0], [0], [1], [0, 0, 1, 1], [], []>} : vector<8x8xf32>, vector<8x32xf32>, vector<8x32xf32> -> vector<8x32xf32>
    %41 = vector.extract_strided_slice %16 {offsets = [0, 0, 8], sizes = [1, 8, 8], strides = [1, 1, 1]} : vector<1x8x32xf32> to vector<1x8x8xf32>
    %42 = vector.extract_strided_slice %18 {offsets = [0, 0, 8], sizes = [1, 8, 8], strides = [1, 1, 1]} : vector<1x8x32xf32> to vector<1x8x8xf32>
    "tpu.trace_start"() <{level = 10 : i32, message = "bqd,bkd->bqk"}> : () -> ()
    %cst_18 = arith.constant dense<0.000000e+00> : vector<1x8x8xf32>
    %43 = tpu.matmul %41, %42, %cst_18 {dimension_numbers = #tpu.dot_dimension_numbers<[2], [2], [1], [1], [0, 0, 0, 1, 1, 1], [0], [0]>} : vector<1x8x8xf32>, vector<1x8x8xf32>, vector<1x8x8xf32> -> vector<1x8x8xf32>
    "tpu.trace_stop"() : () -> ()
    %cst_19 = arith.constant dense<0xFF800000> : vector<1x8xf32>
    %44 = vector.multi_reduction <maximumf>, %43, %cst_19 [2] : vector<1x8x8xf32> to vector<1x8xf32>
    %45 = vector.shape_cast %44 : vector<1x8xf32> to vector<1x8x1xf32>
    %46 = vector.broadcast %45 : vector<1x8x1xf32> to vector<1x8x8xf32>
    %47 = arith.subf %43, %46 : vector<1x8x8xf32>
    %48 = math.exp %47 : vector<1x8x8xf32>
    %cst_20 = arith.constant dense<0.000000e+00> : vector<1x8xf32>
    %49 = vector.multi_reduction <add>, %48, %cst_20 [2] : vector<1x8x8xf32> to vector<1x8xf32>
    %50 = vector.shape_cast %49 : vector<1x8xf32> to vector<1x8x1xf32>
    %51 = tpu.reciprocal %50 {approx = true} : vector<1x8x1xf32> -> vector<1x8x1xf32>
    %52 = vector.broadcast %51 : vector<1x8x1xf32> to vector<1x8x8xf32>
    %53 = arith.mulf %48, %52 : vector<1x8x8xf32>
    %54 = vector.extract_strided_slice %20 {offsets = [0, 0, 8], sizes = [1, 8, 8], strides = [1, 1, 1]} : vector<1x8x32xf32> to vector<1x8x8xf32>
    "tpu.trace_start"() <{level = 10 : i32, message = "bqk,bkd->bqd"}> : () -> ()
    %cst_21 = arith.constant dense<0.000000e+00> : vector<1x8x8xf32>
    %55 = tpu.matmul %53, %54, %cst_21 {dimension_numbers = #tpu.dot_dimension_numbers<[2], [1], [1], [2], [0, 0, 0, 1, 1, 2], [0], [0]>} : vector<1x8x8xf32>, vector<1x8x8xf32>, vector<1x8x8xf32> -> vector<1x8x8xf32>
    "tpu.trace_stop"() : () -> ()
    %56 = vector.shape_cast %55 : vector<1x8x8xf32> to vector<8x8xf32>
    %57 = vector.extract_strided_slice %22 {offsets = [8, 0], sizes = [8, 32], strides = [1, 1]} : vector<32x32xf32> to vector<8x32xf32>
    %cst_22 = arith.constant dense<0.000000e+00> : vector<8x32xf32>
    %58 = tpu.matmul %56, %57, %cst_22 {dimension_numbers = #tpu.dot_dimension_numbers<[1], [0], [0], [1], [0, 0, 1, 1], [], []>} : vector<8x8xf32>, vector<8x32xf32>, vector<8x32xf32> -> vector<8x32xf32>
    %59 = arith.addf %40, %58 : vector<8x32xf32>
    %60 = vector.extract_strided_slice %16 {offsets = [0, 0, 16], sizes = [1, 8, 8], strides = [1, 1, 1]} : vector<1x8x32xf32> to vector<1x8x8xf32>
    %61 = vector.extract_strided_slice %18 {offsets = [0, 0, 16], sizes = [1, 8, 8], strides = [1, 1, 1]} : vector<1x8x32xf32> to vector<1x8x8xf32>
    "tpu.trace_start"() <{level = 10 : i32, message = "bqd,bkd->bqk"}> : () -> ()
    %cst_23 = arith.constant dense<0.000000e+00> : vector<1x8x8xf32>
    %62 = tpu.matmul %60, %61, %cst_23 {dimension_numbers = #tpu.dot_dimension_numbers<[2], [2], [1], [1], [0, 0, 0, 1, 1, 1], [0], [0]>} : vector<1x8x8xf32>, vector<1x8x8xf32>, vector<1x8x8xf32> -> vector<1x8x8xf32>
    "tpu.trace_stop"() : () -> ()
    %cst_24 = arith.constant dense<0xFF800000> : vector<1x8xf32>
    %63 = vector.multi_reduction <maximumf>, %62, %cst_24 [2] : vector<1x8x8xf32> to vector<1x8xf32>
    %64 = vector.shape_cast %63 : vector<1x8xf32> to vector<1x8x1xf32>
    %65 = vector.broadcast %64 : vector<1x8x1xf32> to vector<1x8x8xf32>
    %66 = arith.subf %62, %65 : vector<1x8x8xf32>
    %67 = math.exp %66 : vector<1x8x8xf32>
    %cst_25 = arith.constant dense<0.000000e+00> : vector<1x8xf32>
    %68 = vector.multi_reduction <add>, %67, %cst_25 [2] : vector<1x8x8xf32> to vector<1x8xf32>
    %69 = vector.shape_cast %68 : vector<1x8xf32> to vector<1x8x1xf32>
    %70 = tpu.reciprocal %69 {approx = true} : vector<1x8x1xf32> -> vector<1x8x1xf32>
    %71 = vector.broadcast %70 : vector<1x8x1xf32> to vector<1x8x8xf32>
    %72 = arith.mulf %67, %71 : vector<1x8x8xf32>
    %73 = vector.extract_strided_slice %20 {offsets = [0, 0, 16], sizes = [1, 8, 8], strides = [1, 1, 1]} : vector<1x8x32xf32> to vector<1x8x8xf32>
    "tpu.trace_start"() <{level = 10 : i32, message = "bqk,bkd->bqd"}> : () -> ()
    %cst_26 = arith.constant dense<0.000000e+00> : vector<1x8x8xf32>
    %74 = tpu.matmul %72, %73, %cst_26 {dimension_numbers = #tpu.dot_dimension_numbers<[2], [1], [1], [2], [0, 0, 0, 1, 1, 2], [0], [0]>} : vector<1x8x8xf32>, vector<1x8x8xf32>, vector<1x8x8xf32> -> vector<1x8x8xf32>
    "tpu.trace_stop"() : () -> ()
    %75 = vector.shape_cast %74 : vector<1x8x8xf32> to vector<8x8xf32>
    %76 = vector.extract_strided_slice %22 {offsets = [16, 0], sizes = [8, 32], strides = [1, 1]} : vector<32x32xf32> to vector<8x32xf32>
    %cst_27 = arith.constant dense<0.000000e+00> : vector<8x32xf32>
    %77 = tpu.matmul %75, %76, %cst_27 {dimension_numbers = #tpu.dot_dimension_numbers<[1], [0], [0], [1], [0, 0, 1, 1], [], []>} : vector<8x8xf32>, vector<8x32xf32>, vector<8x32xf32> -> vector<8x32xf32>
    %78 = arith.addf %59, %77 : vector<8x32xf32>
    %79 = vector.extract_strided_slice %16 {offsets = [0, 0, 24], sizes = [1, 8, 8], strides = [1, 1, 1]} : vector<1x8x32xf32> to vector<1x8x8xf32>
    %80 = vector.extract_strided_slice %18 {offsets = [0, 0, 24], sizes = [1, 8, 8], strides = [1, 1, 1]} : vector<1x8x32xf32> to vector<1x8x8xf32>
    "tpu.trace_start"() <{level = 10 : i32, message = "bqd,bkd->bqk"}> : () -> ()
    %cst_28 = arith.constant dense<0.000000e+00> : vector<1x8x8xf32>
    %81 = tpu.matmul %79, %80, %cst_28 {dimension_numbers = #tpu.dot_dimension_numbers<[2], [2], [1], [1], [0, 0, 0, 1, 1, 1], [0], [0]>} : vector<1x8x8xf32>, vector<1x8x8xf32>, vector<1x8x8xf32> -> vector<1x8x8xf32>
    "tpu.trace_stop"() : () -> ()
    %cst_29 = arith.constant dense<0xFF800000> : vector<1x8xf32>
    %82 = vector.multi_reduction <maximumf>, %81, %cst_29 [2] : vector<1x8x8xf32> to vector<1x8xf32>
    %83 = vector.shape_cast %82 : vector<1x8xf32> to vector<1x8x1xf32>
    %84 = vector.broadcast %83 : vector<1x8x1xf32> to vector<1x8x8xf32>
    %85 = arith.subf %81, %84 : vector<1x8x8xf32>
    %86 = math.exp %85 : vector<1x8x8xf32>
    %cst_30 = arith.constant dense<0.000000e+00> : vector<1x8xf32>
    %87 = vector.multi_reduction <add>, %86, %cst_30 [2] : vector<1x8x8xf32> to vector<1x8xf32>
    %88 = vector.shape_cast %87 : vector<1x8xf32> to vector<1x8x1xf32>
    %89 = tpu.reciprocal %88 {approx = true} : vector<1x8x1xf32> -> vector<1x8x1xf32>
    %90 = vector.broadcast %89 : vector<1x8x1xf32> to vector<1x8x8xf32>
    %91 = arith.mulf %86, %90 : vector<1x8x8xf32>
    %92 = vector.extract_strided_slice %20 {offsets = [0, 0, 24], sizes = [1, 8, 8], strides = [1, 1, 1]} : vector<1x8x32xf32> to vector<1x8x8xf32>
    "tpu.trace_start"() <{level = 10 : i32, message = "bqk,bkd->bqd"}> : () -> ()
    %cst_31 = arith.constant dense<0.000000e+00> : vector<1x8x8xf32>
    %93 = tpu.matmul %91, %92, %cst_31 {dimension_numbers = #tpu.dot_dimension_numbers<[2], [1], [1], [2], [0, 0, 0, 1, 1, 2], [0], [0]>} : vector<1x8x8xf32>, vector<1x8x8xf32>, vector<1x8x8xf32> -> vector<1x8x8xf32>
    "tpu.trace_stop"() : () -> ()
    %94 = vector.shape_cast %93 : vector<1x8x8xf32> to vector<8x8xf32>
    %95 = vector.extract_strided_slice %22 {offsets = [24, 0], sizes = [8, 32], strides = [1, 1]} : vector<32x32xf32> to vector<8x32xf32>
    %cst_32 = arith.constant dense<0.000000e+00> : vector<8x32xf32>
    %96 = tpu.matmul %94, %95, %cst_32 {dimension_numbers = #tpu.dot_dimension_numbers<[1], [0], [0], [1], [0, 0, 1, 1], [], []>} : vector<8x8xf32>, vector<8x32xf32>, vector<8x32xf32> -> vector<8x32xf32>
    %97 = arith.addf %78, %96 : vector<8x32xf32>
    %c0_33 = arith.constant 0 : index
    %c0_34 = arith.constant 0 : index
    %c0_35 = arith.constant 0 : index
    %98 = vector.load %arg7[%c0_33, %c0_34, %c0_35] : memref<1x1x32xf32, #tpu.memory_space<vmem>>, vector<1x1x32xf32>
    %99 = vector.shape_cast %98 : vector<1x1x32xf32> to vector<32xf32>
    %100 = vector.shape_cast %99 : vector<32xf32> to vector<1x32xf32>
    %101 = vector.broadcast %100 : vector<1x32xf32> to vector<8x32xf32>
    %102 = arith.addf %97, %101 : vector<8x32xf32>
    %103 = vector.shape_cast %102 : vector<8x32xf32> to vector<1x8x32xf32>
    %104 = arith.addf %3, %103 : vector<1x8x32xf32>
    %c0_36 = arith.constant 0 : index
    %c0_37 = arith.constant 0 : index
    %c0_38 = arith.constant 0 : index
    %105 = vector.load %arg8[%c0_36, %c0_37, %c0_38] : memref<1x1x32xf32, #tpu.memory_space<vmem>>, vector<1x1x32xf32>
    %106 = vector.shape_cast %105 : vector<1x1x32xf32> to vector<32xf32>
    %c0_39 = arith.constant 0 : index
    %c0_40 = arith.constant 0 : index
    %c0_41 = arith.constant 0 : index
    %107 = vector.load %arg9[%c0_39, %c0_40, %c0_41] : memref<1x1x32xf32, #tpu.memory_space<vmem>>, vector<1x1x32xf32>
    %108 = vector.shape_cast %107 : vector<1x1x32xf32> to vector<32xf32>
    %cst_42 = arith.constant dense<0.000000e+00> : vector<1x8xf32>
    %109 = vector.multi_reduction <add>, %104, %cst_42 [2] : vector<1x8x32xf32> to vector<1x8xf32>
    %110 = vector.shape_cast %109 : vector<1x8xf32> to vector<1x8x1xf32>
    %cst_43 = arith.constant 3.200000e+01 : f32
    %111 = vector.broadcast %cst_43 : f32 to vector<1x8x1xf32>
    %112 = arith.divf %110, %111 : vector<1x8x1xf32>
    %113 = vector.broadcast %112 : vector<1x8x1xf32> to vector<1x8x32xf32>
    %114 = arith.subf %104, %113 : vector<1x8x32xf32>
    %115 = arith.mulf %114, %114 : vector<1x8x32xf32>
    %cst_44 = arith.constant dense<0.000000e+00> : vector<1x8xf32>
    %116 = vector.multi_reduction <add>, %115, %cst_44 [2] : vector<1x8x32xf32> to vector<1x8xf32>
    %117 = vector.shape_cast %116 : vector<1x8xf32> to vector<1x8x1xf32>
    %cst_45 = arith.constant 3.200000e+01 : f32
    %118 = vector.broadcast %cst_45 : f32 to vector<1x8x1xf32>
    %119 = arith.divf %117, %118 : vector<1x8x1xf32>
    %120 = vector.broadcast %112 : vector<1x8x1xf32> to vector<1x8x32xf32>
    %121 = arith.subf %104, %120 : vector<1x8x32xf32>
    %cst_46 = arith.constant 9.99999974E-6 : f32
    %122 = vector.broadcast %cst_46 : f32 to vector<1x8x1xf32>
    %123 = arith.addf %119, %122 : vector<1x8x1xf32>
    %124 = math.rsqrt %123 : vector<1x8x1xf32>
    %125 = vector.broadcast %124 : vector<1x8x1xf32> to vector<1x8x32xf32>
    %126 = arith.mulf %121, %125 : vector<1x8x32xf32>
    %127 = vector.shape_cast %106 : vector<32xf32> to vector<1x1x32xf32>
    %128 = vector.broadcast %127 : vector<1x1x32xf32> to vector<1x8x32xf32>
    %129 = arith.mulf %126, %128 : vector<1x8x32xf32>
    %130 = vector.shape_cast %108 : vector<32xf32> to vector<1x1x32xf32>
    %131 = vector.broadcast %130 : vector<1x1x32xf32> to vector<1x8x32xf32>
    %132 = arith.addf %129, %131 : vector<1x8x32xf32>
    %133 = vector.shape_cast %132 : vector<1x8x32xf32> to vector<8x32xf32>
    %c0_47 = arith.constant 0 : index
    %c0_48 = arith.constant 0 : index
    %c0_49 = arith.constant 0 : index
    %134 = vector.load %arg10[%c0_47, %c0_48, %c0_49] : memref<1x32x64xf32, #tpu.memory_space<vmem>>, vector<1x32x64xf32>
    %135 = vector.shape_cast %134 : vector<1x32x64xf32> to vector<32x64xf32>
    %cst_50 = arith.constant dense<0.000000e+00> : vector<8x64xf32>
    %136 = tpu.matmul %133, %135, %cst_50 {dimension_numbers = #tpu.dot_dimension_numbers<[1], [0], [0], [1], [0, 0, 1, 1], [], []>} : vector<8x32xf32>, vector<32x64xf32>, vector<8x64xf32> -> vector<8x64xf32>
    %c0_51 = arith.constant 0 : index
    %c0_52 = arith.constant 0 : index
    %c0_53 = arith.constant 0 : index
    %137 = vector.load %arg11[%c0_51, %c0_52, %c0_53] : memref<1x1x64xf32, #tpu.memory_space<vmem>>, vector<1x1x64xf32>
    %138 = vector.shape_cast %137 : vector<1x1x64xf32> to vector<64xf32>
    %139 = vector.shape_cast %138 : vector<64xf32> to vector<1x64xf32>
    %140 = vector.broadcast %139 : vector<1x64xf32> to vector<8x64xf32>
    %141 = arith.addf %136, %140 : vector<8x64xf32>
    %cst_54 = arith.constant 0.000000e+00 : f32
    %142 = vector.broadcast %cst_54 : f32 to vector<8x64xf32>
    %143 = arith.maximumf %141, %142 : vector<8x64xf32>
    %c0_55 = arith.constant 0 : index
    %c0_56 = arith.constant 0 : index
    %c0_57 = arith.constant 0 : index
    %144 = vector.load %arg12[%c0_55, %c0_56, %c0_57] : memref<1x64x32xf32, #tpu.memory_space<vmem>>, vector<1x64x32xf32>
    %145 = vector.shape_cast %144 : vector<1x64x32xf32> to vector<64x32xf32>
    %cst_58 = arith.constant dense<0.000000e+00> : vector<8x32xf32>
    %146 = tpu.matmul %143, %145, %cst_58 {dimension_numbers = #tpu.dot_dimension_numbers<[1], [0], [0], [1], [0, 0, 1, 1], [], []>} : vector<8x64xf32>, vector<64x32xf32>, vector<8x32xf32> -> vector<8x32xf32>
    %c0_59 = arith.constant 0 : index
    %c0_60 = arith.constant 0 : index
    %c0_61 = arith.constant 0 : index
    %147 = vector.load %arg13[%c0_59, %c0_60, %c0_61] : memref<1x1x32xf32, #tpu.memory_space<vmem>>, vector<1x1x32xf32>
    %148 = vector.shape_cast %147 : vector<1x1x32xf32> to vector<32xf32>
    %149 = vector.shape_cast %148 : vector<32xf32> to vector<1x32xf32>
    %150 = vector.broadcast %149 : vector<1x32xf32> to vector<8x32xf32>
    %151 = arith.addf %146, %150 : vector<8x32xf32>
    %152 = vector.shape_cast %151 : vector<8x32xf32> to vector<1x8x32xf32>
    %153 = arith.addf %132, %152 : vector<1x8x32xf32>
    %c0_62 = arith.constant 0 : index
    %c0_63 = arith.constant 0 : index
    %c0_64 = arith.constant 0 : index
    %154 = vector.load %arg14[%c0_62, %c0_63, %c0_64] : memref<1x1x32xf32, #tpu.memory_space<vmem>>, vector<1x1x32xf32>
    %155 = vector.shape_cast %154 : vector<1x1x32xf32> to vector<32xf32>
    %c0_65 = arith.constant 0 : index
    %c0_66 = arith.constant 0 : index
    %c0_67 = arith.constant 0 : index
    %156 = vector.load %arg15[%c0_65, %c0_66, %c0_67] : memref<1x1x32xf32, #tpu.memory_space<vmem>>, vector<1x1x32xf32>
    %157 = vector.shape_cast %156 : vector<1x1x32xf32> to vector<32xf32>
    %cst_68 = arith.constant dense<0.000000e+00> : vector<1x8xf32>
    %158 = vector.multi_reduction <add>, %153, %cst_68 [2] : vector<1x8x32xf32> to vector<1x8xf32>
    %159 = vector.shape_cast %158 : vector<1x8xf32> to vector<1x8x1xf32>
    %cst_69 = arith.constant 3.200000e+01 : f32
    %160 = vector.broadcast %cst_69 : f32 to vector<1x8x1xf32>
    %161 = arith.divf %159, %160 : vector<1x8x1xf32>
    %162 = vector.broadcast %161 : vector<1x8x1xf32> to vector<1x8x32xf32>
    %163 = arith.subf %153, %162 : vector<1x8x32xf32>
    %164 = arith.mulf %163, %163 : vector<1x8x32xf32>
    %cst_70 = arith.constant dense<0.000000e+00> : vector<1x8xf32>
    %165 = vector.multi_reduction <add>, %164, %cst_70 [2] : vector<1x8x32xf32> to vector<1x8xf32>
    %166 = vector.shape_cast %165 : vector<1x8xf32> to vector<1x8x1xf32>
    %cst_71 = arith.constant 3.200000e+01 : f32
    %167 = vector.broadcast %cst_71 : f32 to vector<1x8x1xf32>
    %168 = arith.divf %166, %167 : vector<1x8x1xf32>
    %169 = vector.broadcast %161 : vector<1x8x1xf32> to vector<1x8x32xf32>
    %170 = arith.subf %153, %169 : vector<1x8x32xf32>
    %cst_72 = arith.constant 9.99999974E-6 : f32
    %171 = vector.broadcast %cst_72 : f32 to vector<1x8x1xf32>
    %172 = arith.addf %168, %171 : vector<1x8x1xf32>
    %173 = math.rsqrt %172 : vector<1x8x1xf32>
    %174 = vector.broadcast %173 : vector<1x8x1xf32> to vector<1x8x32xf32>
    %175 = arith.mulf %170, %174 : vector<1x8x32xf32>
    %176 = vector.shape_cast %155 : vector<32xf32> to vector<1x1x32xf32>
    %177 = vector.broadcast %176 : vector<1x1x32xf32> to vector<1x8x32xf32>
    %178 = arith.mulf %175, %177 : vector<1x8x32xf32>
    %179 = vector.shape_cast %157 : vector<32xf32> to vector<1x1x32xf32>
    %180 = vector.broadcast %179 : vector<1x1x32xf32> to vector<1x8x32xf32>
    %181 = arith.addf %178, %180 : vector<1x8x32xf32>
    %c0_73 = arith.constant 0 : index
    %c0_74 = arith.constant 0 : index
    %c0_75 = arith.constant 0 : index
    %182 = vector.load %arg16[%c0_73, %c0_74, %c0_75] : memref<1x8x32xf32, #tpu.memory_space<vmem>>, vector<1x8x32xf32>
    tpu.vector_store %arg16[%c0_73, %c0_74, %c0_75], %181 {strides = array<i32>} : memref<1x8x32xf32, #tpu.memory_space<vmem>>, vector<1x8x32xf32>,
    return
  }
  func.func @transform_0(%arg0: i32, %arg1: i32) -> (i32, i32, i32) {
    %c0_i32 = arith.constant 0 : i32
    %c0_i32_0 = arith.constant 0 : i32
    %c0_i32_1 = arith.constant 0 : i32
    return %arg0, %c0_i32, %c0_i32_0 : i32, i32, i32
  }
  func.func @transform_1(%arg0: i32, %arg1: i32) -> (i32, i32) {
    %c0_i32 = arith.constant 0 : i32
    %c0_i32_0 = arith.constant 0 : i32
    %c0_i32_1 = arith.constant 0 : i32
    return %c0_i32, %c0_i32_0 : i32, i32
  }
  func.func @transform_2(%arg0: i32, %arg1: i32) -> (i32, i32, i32) {
    %c0_i32 = arith.constant 0 : i32
    %c0_i32_0 = arith.constant 0 : i32
    %c0_i32_1 = arith.constant 0 : i32
    return %arg1, %c0_i32, %c0_i32_0 : i32, i32, i32
  }
  func.func @transform_3(%arg0: i32, %arg1: i32) -> (i32, i32, i32) {
    %c0_i32 = arith.constant 0 : i32
    %c0_i32_0 = arith.constant 0 : i32
    %c0_i32_1 = arith.constant 0 : i32
    return %arg1, %c0_i32, %c0_i32_0 : i32, i32, i32
  }
  func.func @transform_4(%arg0: i32, %arg1: i32) -> (i32, i32, i32) {
    %c0_i32 = arith.constant 0 : i32
    %c0_i32_0 = arith.constant 0 : i32
    %c0_i32_1 = arith.constant 0 : i32
    return %arg1, %c0_i32, %c0_i32_0 : i32, i32, i32
  }
  func.func @transform_5(%arg0: i32, %arg1: i32) -> (i32, i32, i32) {
    %c0_i32 = arith.constant 0 : i32
    %c0_i32_0 = arith.constant 0 : i32
    %c0_i32_1 = arith.constant 0 : i32
    return %arg1, %c0_i32, %c0_i32_0 : i32, i32, i32
  }
  func.func @transform_6(%arg0: i32, %arg1: i32) -> (i32, i32, i32) {
    %c0_i32 = arith.constant 0 : i32
    %c0_i32_0 = arith.constant 0 : i32
    %c0_i32_1 = arith.constant 0 : i32
    return %arg1, %c0_i32, %c0_i32_0 : i32, i32, i32
  }
  func.func @transform_7(%arg0: i32, %arg1: i32) -> (i32, i32, i32) {
    %c0_i32 = arith.constant 0 : i32
    %c0_i32_0 = arith.constant 0 : i32
    %c0_i32_1 = arith.constant 0 : i32
    return %arg1, %c0_i32, %c0_i32_0 : i32, i32, i32
  }
  func.func @transform_8(%arg0: i32, %arg1: i32) -> (i32, i32, i32) {
    %c0_i32 = arith.constant 0 : i32
    %c0_i32_0 = arith.constant 0 : i32
    %c0_i32_1 = arith.constant 0 : i32
    return %arg1, %c0_i32, %c0_i32_0 : i32, i32, i32
  }
  func.func @transform_9(%arg0: i32, %arg1: i32) -> (i32, i32, i32) {
    %c0_i32 = arith.constant 0 : i32
    %c0_i32_0 = arith.constant 0 : i32
    %c0_i32_1 = arith.constant 0 : i32
    return %arg1, %c0_i32, %c0_i32_0 : i32, i32, i32
  }
  func.func @transform_10(%arg0: i32, %arg1: i32) -> (i32, i32, i32) {
    %c0_i32 = arith.constant 0 : i32
    %c0_i32_0 = arith.constant 0 : i32
    %c0_i32_1 = arith.constant 0 : i32
    return %arg1, %c0_i32, %c0_i32_0 : i32, i32, i32
  }
  func.func @transform_11(%arg0: i32, %arg1: i32) -> (i32, i32, i32) {
    %c0_i32 = arith.constant 0 : i32
    %c0_i32_0 = arith.constant 0 : i32
    %c0_i32_1 = arith.constant 0 : i32
    return %arg1, %c0_i32, %c0_i32_0 : i32, i32, i32
  }
  func.func @transform_12(%arg0: i32, %arg1: i32) -> (i32, i32, i32) {
    %c0_i32 = arith.constant 0 : i32
    %c0_i32_0 = arith.constant 0 : i32
    %c0_i32_1 = arith.constant 0 : i32
    return %arg1, %c0_i32, %c0_i32_0 : i32, i32, i32
  }
  func.func @transform_13(%arg0: i32, %arg1: i32) -> (i32, i32, i32) {
    %c0_i32 = arith.constant 0 : i32
    %c0_i32_0 = arith.constant 0 : i32
    %c0_i32_1 = arith.constant 0 : i32
    return %arg1, %c0_i32, %c0_i32_0 : i32, i32, i32
  }
  func.func @transform_14(%arg0: i32, %arg1: i32) -> (i32, i32, i32) {
    %c0_i32 = arith.constant 0 : i32
    %c0_i32_0 = arith.constant 0 : i32
    %c0_i32_1 = arith.constant 0 : i32
    return %arg0, %c0_i32, %c0_i32_0 : i32, i32, i32
  }
}

</mosaic_0001>

<bundles_post_ra>
// kernel: tpu_custom_call.1
= control target key start
LH: loop header
LB: loop body
LE: loop exit
PB: predicated region body
PF: predicated region fallthrough
CT: control target
= control target key end

     0   :  { %s3201_s0 = inlined_call_operand.hbm [shape: f32[2,8,32], index: 0, kind: input, shape index: {}]   ;;  %s3202_s1 = inlined_call_operand.hbm [shape: f32[8,32], index: 1, kind: input, shape index: {}]   ;;  %s3203_s2 = inlined_call_operand.vmem [shape: f32[2,32,96], index: 2, kind: input, shape index: {}]   ;;  %s3204_s3 = inlined_call_operand.vmem [shape: f32[2,1,96], index: 3, kind: input, shape index: {}]   ;;  %s3205_s4 = inlined_call_operand.vmem [shape: f32[2,32,32], index: 4, kind: input, shape index: {}]   ;;  %s3206_s5 = inlined_call_operand.vmem [shape: f32[2,1,32], index: 5, kind: input, shape index: {}]   ;;  %s3207_s6 = inlined_call_operand.vmem [shape: f32[2,1,32], index: 6, kind: input, shape index: {}]   ;;  %s3208_s7 = inlined_call_operand.vmem [shape: f32[2,1,32], index: 7, kind: input, shape index: {}]   ;;  %s3209_s8 = inlined_call_operand.vmem [shape: f32[2,32,64], index: 8, kind: input, shape index: {}]   ;;  %s3210_s9 = inlined_call_operand.vmem [shape: f32[2,1,64], index: 9, kind: input, shape index: {}]   ;;  %s3211_s10 = inlined_call_operand.vmem [shape: f32[2,64,32], index: 10, kind: input, shape index: {}]   ;;  %s3212_s11 = inlined_call_operand.vmem [shape: f32[2,1,32], index: 11, kind: input, shape index: {}]   ;;  %s3213_s12 = inlined_call_operand.vmem [shape: f32[2,1,32], index: 12, kind: input, shape index: {}]   ;;  %s3214_s13 = inlined_call_operand.vmem [shape: f32[2,1,32], index: 13, kind: input, shape index: {}]   ;;  %s3215_s14 = inlined_call_operand.hbm [shape: f32[2,8,32], index: 14, kind: output, shape index: {}]  }
   0x1   :  { %3230 = sst [smem:[#allocation24_spill]] %s3201_s0 }
   0x2   :  { %3231 = sst [smem:[#allocation25_spill]] %s3202_s1 }
   0x3   :  { %3232 = sst [smem:[#allocation26_spill]] %s3203_s2 }
   0x4   :  { %3233 = sst [smem:[#allocation27_spill]] %s3205_s4 }
   0x5   :  { %3234 = sst [smem:[#allocation28_spill]] %s3208_s7 }
   0x6   :  { %3235 = sst [smem:[#allocation29_spill]] %s3209_s8 }
   0x7   :  { %3236 = sst [smem:[#allocation30_spill]] %s3211_s10 }
   0x8   :  { %3237 = sst [smem:[#allocation31_spill]] %s3212_s11 }
   0x9   :  { %3238 = sst [smem:[#allocation32_spill]] %s3213_s12 }
   0xa   :  { %3239 = sst [smem:[#allocation33_spill]] %s3214_s13 }
   0xb   :  { %3240 = sst [smem:[#allocation34_spill]] %s3215_s14 }
   0xc   :  { %19 = vsyncpa [#allocation3], 0 }
   0xd   :  { %21 = vsyncpa [#allocation3 + $0x1], 0 }
   0xe   :  { %22 = vsyncpa [#allocation6], 0 }
   0xf   :  { %23 = vsyncpa [#allocation4], 0 }
  0x10   :  { %25 = vsyncpa [#allocation4 + $0x1], 0  ;;  %s2793_s29 = smov 0   ;;  %s2795_s30 = smov 0  }
  0x11   :  { %s2797_s15 = smov 0   ;;  %s2799_s16 = smov 0  }
  0x12   :  { %s2801_s17 = smov 0   ;;  %s2803_s18 = smov 0  }
  0x13   :  { %s2805_s19 = smov 0   ;;  %s2807_s20 = smov 0  }
  0x14 LB: > { %3241 = sst [smem:[#allocation11_spill]] %s2672_s29  ;;  %s2225_s21 = sadd.s32 4294967295, %s2700_s20   ;;  %s2700_s20 = sphi %s2807_s20, %s31_s20   ;;  %s2696_s19 = sphi %s2805_s19, %s3294_s19   ;;  %s2692_s18 = sphi %s2803_s18, %s3293_s18   ;;  %s2688_s17 = sphi %s2801_s17, %s3292_s17   ;;  %s2684_s16 = sphi %s2799_s16, %s3291_s16   ;;  %s2680_s15 = sphi %s2797_s15, %s3290_s15   ;;  %s2676_s30 = sphi %s2795_s30, %s3289_s30   ;;  %s2672_s29 = sphi %s2793_s29, %s3288_s29  }
  0x15   : > { %3242 = sst [smem:[#allocation12_spill]] %s2676_s30  ;;  %s2226_s22 = sadd.s32 4294967294, %s2700_s20  }
  0x16   : > { %3243 = sst [smem:[#allocation13_spill]] %s2680_s15  ;;  %p63_p0 = scmp.ne.s32.totalorder %s2676_s30, %s2672_s29 }
  0x17   : > { %3244 = sst [smem:[#allocation14_spill]] %s2688_s17  ;;  %p2837_p1 = scmp.eq.s32.totalorder %s2225_s21, 0 }
  0x18   : > { %3245 = sst [smem:[#allocation15_spill]] %s2692_s18  ;;  %p2841_p2 = scmp.eq.s32.totalorder %s2225_s21, 3 }
  0x19   : > { %3246 = sst [smem:[#allocation16_spill]] %s2696_s19  ;;  %p426_p3 = scmp.eq.s32.totalorder %s2226_s22, 3 }
  0x1a   : > { %3247 = sst [smem:[#allocation17_spill]] %s2700_s20  ;;  %p2847_p4 = por %p2837_p1, %p63_p0 }
  0x1b   : > { %p2227_p5 = scmp.ge.s32.totalorder %s2700_s20, 1  ;;  %p2852_p6 = por %p426_p3, %p63_p0 }
  0x1c   : > { %p433_p7 = scmp.lt.s32.totalorder %s2700_s20, 5  ;;  %s2702_s28 = smov [#allocation5]  }
  0x1d   : > { %s3251_s26 = scalar_select %p2852_p6, 1, 0 }
  0x1e   : > { %p2857_p8 = pnand %p2227_p5, %p433_p7  ;;  %s446_s21 = sshll.u32 %s2702_s28, 4  ;;  %s447_s21 = int_to_ptr.vmem [resolvable:$true] %s446_s21 }
  0x1f   : > { %3252 = sst [smem:[#allocation18_spill]] %s3251_s26  ;;  %s40_s22 = sadd.s32 1, %s2692_s18 }
  0x20   : > { %p2432_p9 = pneg %p2857_p8  ;;  %s2557_s29 = scalar_lea.vmem %s447_s21, 128 }
  0x21   : > { %p2558_p12 = scmp.ne.s32.totalorder %s447_s21, %s2557_s29  ;;  %p2565_p3 = scmp.lt.s32.totalorder %s447_s21, %s447_s21 }
  0x22   : > { %p2433_p10 = pnand %p2432_p9, %p2837_p1  ;;  %p2566_p6 = scmp.lt.s32.totalorder %s2557_s29, %s2557_s29 }
  0x24   : > { %p2548_p11 = pneg %p2433_p10  ;;  %p2567_p5 = por %p2566_p6, %p2565_p3 }
  0x26   : > { %p2560_p13 = pnand %p2558_p12, %p2548_p11 }
  0x28   : > { %p2561_p0 = pneg %p2560_p13 }
  0x2a   : > { %p2568_p7 = pnand %p2567_p5, %p2561_p0 }
  0x2c   : > { %2571 = shalt.err (!%p2568_p7)
}
  0x2d   : > { %s3254_s1 = sld [smem:[#allocation25_spill]]  ;;  %p41_p9 = scmp.ge.s32.totalorder %s40_s22, 2 }
  0x2e   : > { %s43_s29 = sadd.s32 1, %s2696_s19  ;;  %s50_s28 = sadd.s32 1, %s2680_s15 }
  0x2f   : > { %p57_p6 = scmp.ne.s32.totalorder %s2680_s15, %s2676_s30  ;;  %s3296_s22 = smov (%p41_p9, %s40_s22), 0 }
  0x30   : > { %3255 = sst [smem:[#allocation19_spill]] %s3296_s22  ;;  %s3298_s29 = smov (!%p41_p9, %s43_s29), %s2696_s19 }
  0x31   : > { %p58_p11 = scmp.eq.s32.totalorder %s2700_s20, 0  ;;  %p2879_p12 = por %p2841_p2, %p57_p6 }
  0x32   : > { %p45_p13 = scmp.ge.s32.totalorder %s3298_s29, 2  ;;  %p2445_p0 = scmp.lt.s32.totalorder %s2700_s20, 4 }
  0x33   : > { %2435 = dma.hbm_to_vmem [thread:$0]  (!%p2433_p10), %s3254_s1, 128, %s447_s21, [#allocation6]  }
  0x34   : > { %s3256_s14 = scalar_select %p2879_p12, 1, 0 }
  0x35   : > { %p59_p3 = por %p58_p11, %p57_p6  ;;  %s457_s26 = sand.u32 1, %s2680_s15  }
  0x36   : > { %3257 = sst [smem:[#allocation20_spill]] %s3256_s14  ;;  %s3300_s29 = smov (%p45_p13, %s3298_s29), 0 }
  0x37   : > { %3258 = sst [smem:[#allocation21_spill]] %s3300_s29  ;;  %s2230_s21 = sshll.u32 %s457_s26, 3 }
  0x38   : > { %s47_s1 = ssub.s32 %s2696_s19, %s3300_s29  ;;  %s2231_s22 = sshll.u32 %s2696_s19, 7 }
  0x39   : > { %p48_p10 = scmp.eq.s32.totalorder %s47_s1, 0  ;;  %s3259_s0 = sld [smem:[#allocation24_spill]] }
  0x3a   : > { %s461_s13 = scalar_lea.vmem [#allocation2], %s2230_s21  ;;  %p2898_p2 = pnand %p2445_p0, %p59_p3 }
  0x3b   : > { %s468_s12 = sshll.u32 %s461_s13, 4  ;;  %s458_s10 = scalar_lea.sflag [#allocation3], %s457_s26  ;;  %s469_s12 = int_to_ptr.vmem [resolvable:$true] %s468_s12 }
  0x3c   : > { %s2894_s11 = scalar_select %p48_p10, %s2680_s15, %s50_s28  }
  0x3d   : > { %p2574_p5 = pneg %p2898_p2  ;;  %s2585_s1 = scalar_lea.vmem %s469_s12, 128 }
  0x3e   : > { %3260 = sst [smem:[#allocation22_spill]] %s2894_s11  ;;  %p2586_p7 = scmp.ne.s32.totalorder %s469_s12, %s2585_s1 }
  0x3f   : > { %s466_s24 = scalar_lea.hbm %s3259_s0, %s2231_s22  ;;  %s2703_s17 = smov [#allocation2]  }
  0x40   : > { %p2588_p9 = pnand %p2586_p7, %p2574_p5  ;;  %s2590_s18 = sshll.u32 %s2703_s17, 4  ;;  %s2591_s18 = int_to_ptr.vmem [resolvable:$false] %s2590_s18 }
  0x41   : > { %s2592_s13 = scalar_lea.vmem %s2591_s18, 256  ;;  %p2593_p11 = scmp.lt.s32.totalorder %s469_s12, %s2591_s18 }
  0x42   : > { %p2589_p6 = pneg %p2588_p9  ;;  %p2594_p13 = scmp.lt.s32.totalorder %s2592_s13, %s2585_s1 }
  0x44   : > { %p2595_p10 = por %p2594_p13, %p2593_p11 }
  0x46   : > { %p2596_p12 = pnand %p2595_p10, %p2589_p6 }
  0x48   : > { %2599 = shalt.err (!%p2596_p12)
}
  0x49   : > { %2439 = dma.hbm_to_vmem [thread:$0]  (!%p2898_p2), %s466_s24, 128, %s469_s12, %s458_s10  }
  0x4a   : > { %557 = sbr.rel (%p2857_p8) target bundleno = 3564 (0xdec), region = 76 }
  0x4f   : > { %s2909_s22 = sand.u32 1, %s2676_s30  }
  0x50   : > { %3262 = sst [smem:[#allocation23_spill]] %s2909_s22  ;;  %s2233_s28 = sshll.u32 %s2909_s22, 3 }
  0x51   : > { %s560_s26 = scalar_lea.sflag [#allocation3], %s2909_s22  ;;  %s563_s21 = scalar_lea.vmem [#allocation2], %s2233_s28 }
  0x52   : > { %2659 = dma.done.wait (%p2847_p4), %s560_s26, 128  }
  0x53   : > { %2661 = vsyncadd (%p2847_p4), %s560_s26, 4294967168 }
  0x54   : > { %2663 = dma.done.wait (%p2837_p1), [#allocation6], 128  }
  0x55   : > { %2665 = vsyncadd (%p2837_p1), [#allocation6], 4294967168  ;;  %p656_p8 = scmp.lt.s32.totalorder %s2684_s16, 1  ;;  %s3263_s2 = sld [smem:[#allocation26_spill]] }
  0x56   : > { %s3264_s4 = sld [smem:[#allocation27_spill]]  ;;  %s2979_s17 = scalar_lea.vmem [#allocation7], %s2233_s28 }
  0x57   : > { %s2923_s10 = scalar_select %p656_p8, %s2684_s16, 1 }
  0x58   : > { %s3266_s8 = sld [smem:[#allocation29_spill]]  ;;  %p2244_p1 = scmp.ne.s32.totalorder %s2684_s16, 0 }
  0x59   : > { %s2276_s12 = sshll.u32 %s2923_s10, 5  ;;  %s2279_s30 = sshll.u32 %s2923_s10, 6 }
  0x5a   : > { %s3267_s29 = sld [smem:[#allocation30_spill]] }
  0x5b   : > { %s2933_s1 = scalar_lea.vmem %s3263_s2, %s2276_s12  ;;  %s3268_s15 = sld [smem:[#allocation31_spill]] }
  0x5c   : > { %s2938_s13 = scalar_lea.vmem %s3264_s4, %s2276_s12  ;;  %s685_s4 = scalar_lea.vmem %s3210_s9, %s2923_s10 }
  0x5d   : > { %s3269_s22 = sld [smem:[#allocation32_spill]] }
  0x5e   : > { %s2955_s2 = scalar_lea.vmem %s3266_s8, %s2276_s12  ;;  %s3270_s8 = sld [smem:[#allocation33_spill]] }
  0x60   : > { %s2965_s20 = scalar_lea.vmem %s3267_s29, %s2279_s30  ;;  %703 = sbr.rel (%p2244_p1) target bundleno = 107 (0x6b), region = 88 }
  0x61   : > { %s693_s25 = scalar_lea.vmem %s3268_s15, %s2923_s10 }
  0x63   : > { %s696_s14 = scalar_lea.vmem %s3269_s22, %s2923_s10 }
  0x64   : > { %s699_s7 = scalar_lea.vmem %s3270_s8, %s2923_s10 }
  0x65   : > { %v704_v0 = vld [vmem:[%s563_s21] sm:$0xff]  ;;  %v706_v1 = vld [vmem:[#allocation5] sm:$0xff]  ;;  %vm708_vm0 = vcmask 261120  }
  0x66   : > { %v705_v2 = vmul.f32 5.656854, %v704_v0 }
  0x68   : > { %v707_v3 = vadd.f32 %v706_v1, %v705_v2 }
  0x6a   : > { %709 = vst.msk [vmem:[%s2979_s17] sm:$0xff] %vm708_vm0, %v707_v3 }
  0x6b PF: > { %v714_v4 = vld [vmem:[%s2933_s1 + $0x18] sm:$0xff]  ;;  %v2704_v5 = vmov 0.0   ;;  %v713_v6 = vld [vmem:[%s2933_s1 + $0x10] sm:$0xff]  ;;  %vm2705_vm1 = vmmov 0   ;;  %v712_v7 = vld [vmem:[%s2933_s1 + $0x8] sm:$0xff]  ;;  %vm722_vm2 = vcmask 261120   ;;  %s3271_s15 = scalar_lea.vmem %s3204_s3, %s2923_s10  ;;  %s3272_s27 = scalar_lea.vmem %s3206_s5, %s2923_s10 }
  0x6c   : > { %2323 = vmatprep.subr.mxu0 %v2704_v5  ;;  %2331 = vmatprep.mubr.msk.f32.mxu0 %vm2705_vm1, %v2704_v5  ;;  %v711_v8 = vld [vmem:[%s2933_s1] sm:$0xff]  ;;  %s2706_s16 = smov 96   ;;  %s2707_s29 = smov 120   ;;  %vm804_vm3 = vcmask 64512   ;;  %v798_v43 = vld [vmem:[%s2938_s13 + $0x8] sm:$0xff]  ;;  %vm1895_vm4 = vcmask 523264  }
  0x6d   : > { %2324 = vmatpush3.msra.mxu0 %v714_v4  ;;  %2339 = vmatprep.subr.mxu1 %v2704_v5  ;;  %v2245_v10 = vld [vmem:[%s3271_s15] ss:$0 sm:$0xff]  ;;  %s2708_s22 = smov 88   ;;  %s2709_s28 = smov 56  }
  0x6e   : > { %2325 = vmatprep.subr.mxu0 %v2704_v5  ;;  %2341 = vmatprep.mubr.msk.f32.mxu1 %vm2705_vm1, %v2704_v5  ;;  %s2710_s21 = smov 64   ;;  %s2711_s23 = smov 80   ;;  %v797_v42 = vld [vmem:[%s2938_s13] sm:$0xff] }
  0x6f   : > { %2326 = vmatpush3.msra.mxu0 %v713_v6  ;;  %s2712_s1 = smov 112   ;;  %s2713_s18 = smov 72   ;;  %v799_v6 = vld [vmem:[%s2938_s13 + $0x10] sm:$0xff] }
  0x70   : > { %2327 = vmatprep.subr.mxu0 %v2704_v5  ;;  %s2714_s0 = smov 104   ;;  %s2715_s26 = smov 48  }
  0x71   : > { %2328 = vmatpush3.msra.mxu0 %v712_v7  ;;  %v2996_v9 = vld [vmem:[%s2979_s17] sm:$0xff]  ;;  %s2716_s11 = smov 40   ;;  %s3273_s24 = scalar_lea.vmem %s3207_s6, %s2923_s10 }
  0x72   : > { %2329 = vmatprep.subr.mxu0 %v2704_v5  ;;  %s3274_s15 = sld [smem:[#allocation28_spill]] }
  0x73   : > { %2330 = vmatpush3.msra.mxu0 %v711_v8 }
  0x74   : > { %2332 = vmatmul.mubr.msk.f32.vlgmr.msra.gmra.mxu0 %vm722_vm2, %v2996_v9  ;;  %2334 = vmatprep.subr.mxu0 %v2704_v5 }
  0x75   : > { %2336 = vmatprep.mubr.msk.f32.mxu0 %vm2705_vm1, %v2704_v5 }
 0x134   : > { %v792_v11 = vpop.f32.mrf.mxu0 }
 0x135   : > { %v3009_v12 = vadd.f32 %v2245_v10, %v792_v11 }
 0x136   : > { %v2333_v13 = vpop.f32.mrf.mxu0 }
 0x137   : > { %802 = vrot.lane.b32.xlu0 %v3009_v12, %s2706_s16  ;;  %v3013_v14 = vmul.f32 0.35355338, %v3009_v12  ;;  %s3275_s16 = scalar_lea.vmem %s3274_s15, %s2923_s10 }
 0x139   : > { %967 = vrot.lane.b32.xlu1 %v3013_v14, %s2707_s29 }
 0x13b   : > { %969 = vrot.lane.b32.xlu0 %v3009_v12, %s2708_s22 }
 0x1a9   : > { %v803_v15 = vpop.permute.xlu0 %802 }
 0x1aa   : > { %2335 = vmatpush3.xpose.msk.msra.mxu0 %vm804_vm3, %v803_v15 }
 0x1ab   : > { %2344 = vmatprep.subr.mxu0 %v2704_v5  ;;  %v968_v17 = vpop.permute.xlu1 %967 }
 0x1ad   : > { %v970_v16 = vpop.permute.xlu0 %969  ;;  %2337 = vmatmul.mubr.msk.f32.vlgmr.msra.gmra.mxu0 %vm804_vm3, %v3013_v14 }
 0x1ae   : > { %2345 = vmatpush3.xpose.msk.msra.mxu0 %vm804_vm3, %v970_v16  ;;  %2346 = vmatprep.mubr.msk.f32.mxu0 %vm2705_vm1, %v2704_v5 }
 0x1af   : > { %2354 = vmatprep.subr.mxu0 %v2704_v5 }
 0x1b1   : > { %2347 = vmatmul.mubr.msk.f32.vlgmr.msra.gmra.mxu0 %vm804_vm3, %v968_v17 }
 0x1b2   : > { %2356 = vmatprep.mubr.msk.f32.mxu0 %vm2705_vm1, %v2704_v5  ;;  %2355 = vmatpush3.msra.mxu0 %v798_v43  ;;  %v1887_v43 = vld [vmem:[%s2965_s20 + $0x38] sm:$0xff] }
 0x1b3   : > { %2364 = vmatprep.subr.mxu0 %v2704_v5 }
 0x26d   : > { %v876_v18 = vpop.f32.mrf.mxu0 }
 0x26e   : > { %v880_v19 = vsel %vm804_vm3, %v876_v18, -inf }
 0x26f   : > { %881 = vmax.xlane.f32.xlu1 %v880_v19  ;;  %v2338_v20 = vpop.f32.mrf.mxu0 }
 0x270   : > { %v800_v20 = vld [vmem:[%s2938_s13 + $0x18] sm:$0xff] }
 0x271   : > { %v1041_v21 = vpop.f32.mrf.mxu0 }
 0x272   : > { %v1045_v22 = vsel %vm804_vm3, %v1041_v21, -inf }
 0x273   : > { %1046 = vmax.xlane.f32.xlu0 %v1045_v22  ;;  %v2348_v23 = vpop.f32.mrf.mxu0 }
 0x2f8   : > { %v882_v24 = vpop.xlane.xlu1 %881 }
 0x2f9   : > { %v883_v25 = vsub.f32 %v876_v18, %v882_v24 }
 0x2fb   : > { %v884_v26 = vmul.f32 1.442695, %v883_v25 }
 0x2fc   : > { %v1047_v27 = vpop.xlane.xlu0 %1046 }
 0x2fd   : > { %2526 = vpow2.f32 %v884_v26  ;;  %v1048_v28 = vsub.f32 %v1041_v21, %v1047_v27 }
 0x2ff   : > { %v1049_v29 = vmul.f32 1.442695, %v1048_v28 }
 0x301   : > { %2528 = vpow2.f32 %v1049_v29  ;;  %v2263_v29 = vld [vmem:[%s3272_s27] ss:$0 sm:$0xff]  ;;  %s2014_s27 = sshll.u32 %s2979_s17, 4  ;;  %s2015_s27 = int_to_ptr.vmem [resolvable:$true] %s2014_s27 }
 0x302   : > { %s2600_s15 = scalar_lea.vmem %s2015_s27, 128 }
 0x303   : > { %p2601_p4 = scmp.ne.s32.totalorder %s2015_s27, %s2600_s15 }
 0x30a   : > { %v2527_v30 = vpop.eup %2526 }
 0x30b   : > { %v886_v31 = vsel %vm804_vm3, %v2527_v30, 0.0 }
 0x30c   : > { %887 = vadd.xlane.f32.xlu0 %v886_v31 }
 0x30e   : > { %v2529_v32 = vpop.eup %2528 }
 0x30f   : > { %v1051_v33 = vsel %vm804_vm3, %v2529_v32, 0.0 }
 0x310   : > { %1052 = vadd.xlane.f32.xlu1 %v1051_v33 }
 0x321   : > { %1056 = vrot.lane.b32.xlu1 %v3009_v12, %s2709_s28 }
 0x322   : > { %891 = vrot.lane.b32.xlu0 %v3009_v12, %s2710_s21 }
 0x325   : > { %1280 = vrot.lane.b32.xlu1 %v3009_v12, %s2711_s23 }
 0x326   : > { %1278 = vrot.lane.b32.xlu0 %v3013_v14, %s2712_s1 }
 0x395   : > { %v888_v34 = vpop.xlane.xlu0 %887 }
 0x396   : > { %2530 = vrcp.f32 %v888_v34 }
 0x399   : > { %v1053_v35 = vpop.xlane.xlu1 %1052  ;;  %v892_v36 = vpop.permute.xlu0 %891 }
 0x39a   : > { %2532 = vrcp.f32 %v1053_v35  ;;  %2340 = vmatpush3.msra.mxu1 %v892_v36 }
 0x39b   : > { %2349 = vmatprep.subr.mxu1 %v2704_v5 }
 0x39d   : > { %v1057_v39 = vpop.permute.xlu1 %1056  ;;  %v1279_v49 = vpop.permute.xlu0 %1278 }
 0x3a1   : > { %v1281_v47 = vpop.permute.xlu1 %1280 }
 0x3a3   : > { %v2531_v37 = vpop.eup %2530 }
 0x3a4   : > { %v890_v38 = vmul.f32 %v2531_v37, %v2527_v30 }
 0x3a6   : > { %2342 = vmatmul.mubr.msk.f32.vlgmr.msra.gmra.mxu1 %vm804_vm3, %v890_v38 }
 0x3a7   : > { %v2533_v40 = vpop.eup %2532  ;;  %2350 = vmatpush3.msra.mxu1 %v1057_v39  ;;  %2351 = vmatprep.mubr.msk.f32.mxu1 %vm2705_vm1, %v2704_v5 }
 0x3a8   : > { %v1055_v41 = vmul.f32 %v2533_v40, %v2529_v32  ;;  %2359 = vmatprep.subr.mxu1 %v2704_v5  ;;  %v1798_v40 = vld [vmem:[%s2955_s2 + $0x18] sm:$0xff] }
 0x3aa   : > { %2352 = vmatmul.mubr.msk.f32.vlgmr.msra.gmra.mxu1 %vm804_vm3, %v1055_v41  ;;  %v1797_v41 = vld [vmem:[%s2955_s2 + $0x10] sm:$0xff] }
 0x3ab   : > { %2361 = vmatprep.mubr.msk.f32.mxu1 %vm2705_vm1, %v2704_v5  ;;  %2360 = vmatpush3.msra.mxu1 %v797_v42  ;;  %v1795_v42 = vld [vmem:[%s2955_s2] sm:$0xff] }
 0x3ac   : > { %2369 = vmatprep.subr.mxu1 %v2704_v5 }
 0x466   : > { %v963_v44 = vpop.f32.mrf.mxu1 }
 0x467   : > { %2362 = vmatmul.mubr.msk.f32.vlgmr.msra.gmra.mxu1 %vm804_vm3, %v963_v44  ;;  %v1886_v44 = vld [vmem:[%s2965_s20 + $0x30] sm:$0xff] }
 0x468   : > { %v2343_v45 = vpop.f32.mrf.mxu1  ;;  %2371 = vmatprep.mubr.msk.f32.mxu1 %vm2705_vm1, %v2704_v5 }
 0x469   : > { %v1885_v45 = vld [vmem:[%s2965_s20 + $0x28] sm:$0xff] }
 0x46a   : > { %v1128_v46 = vpop.f32.mrf.mxu1 }
 0x46b   : > { %2357 = vmatmul.mubr.msk.f32.vlgmr.msra.gmra.mxu0 %vm804_vm3, %v1128_v46  ;;  %v1884_v46 = vld [vmem:[%s2965_s20 + $0x20] sm:$0xff] }
 0x46c   : > { %2365 = vmatpush3.xpose.msk.msra.mxu0 %vm804_vm3, %v1281_v47  ;;  %v2353_v48 = vpop.f32.mrf.mxu1  ;;  %2366 = vmatprep.mubr.msk.f32.mxu0 %vm2705_vm1, %v2704_v5  ;;  %v1883_v47 = vld [vmem:[%s2965_s20 + $0x18] sm:$0xff] }
 0x46d   : > { %2374 = vmatprep.subr.mxu0 %v2704_v5 }
 0x46f   : > { %2367 = vmatmul.mubr.msk.f32.vlgmr.msra.gmra.mxu0 %vm804_vm3, %v1279_v49 }
 0x470   : > { %2376 = vmatprep.mubr.msk.f32.mxu0 %vm2705_vm1, %v2704_v5  ;;  %2375 = vmatpush3.msra.mxu0 %v799_v6 }
 0x471   : > { %2384 = vmatprep.subr.mxu0 %v2704_v5 }
 0x527   : > { %v1274_v50 = vpop.f32.mrf.mxu1 }
 0x529   : > { %v2363_v51 = vpop.f32.mrf.mxu1 }
 0x52b   : > { %v1201_v52 = vpop.f32.mrf.mxu0 }
 0x52c   : > { %v1275_v53 = vadd.f32 %v1274_v50, %v1201_v52  ;;  %v2264_v52 = vld [vmem:[%s3273_s24] ss:$0 sm:$0xff]  ;;  %s3282_s24 = sld [smem:[#allocation34_spill]] }
 0x52d   : > { %v2358_v54 = vpop.f32.mrf.mxu0 }
 0x52e   : > { %v2265_v54 = vld [vmem:[%s3275_s16] ss:$0 sm:$0xff] }
 0x52f   : > { %v1352_v55 = vpop.f32.mrf.mxu0 }
 0x530   : > { %v1356_v56 = vsel %vm804_vm3, %v1352_v55, -inf }
 0x531   : > { %1357 = vmax.xlane.f32.xlu1 %v1356_v56  ;;  %v2368_v57 = vpop.f32.mrf.mxu0 }
 0x532   : > { %v1882_v57 = vld [vmem:[%s2965_s20 + $0x10] sm:$0xff] }
 0x542   : > { %1519 = vrot.lane.b32.xlu1 %v3009_v12, %s2713_s18 }
 0x546   : > { %1517 = vrot.lane.b32.xlu1 %v3013_v14, %s2714_s0 }
 0x5ba   : > { %v1358_v58 = vpop.xlane.xlu1 %1357 }
 0x5bb   : > { %v1359_v59 = vsub.f32 %v1352_v55, %v1358_v58  ;;  %v1881_v58 = vld [vmem:[%s2965_s20 + $0x8] sm:$0xff] }
 0x5bd   : > { %v1360_v60 = vmul.f32 1.442695, %v1359_v59  ;;  %v1880_v59 = vld [vmem:[%s2965_s20] sm:$0xff]  ;;  %s3278_s20 = sld [smem:[#allocation23_spill]] }
 0x5be   : > { %v1520_v2 = vpop.permute.xlu1 %1519 }
 0x5bf   : > { %2534 = vpow2.f32 %v1360_v60  ;;  %v2266_v60 = vld [vmem:[%s685_s4] ss:$0 sm:$0xff]  ;;  %s3277_s4 = sld [smem:[#allocation14_spill]] }
 0x5c2   : > { %v1518_v4 = vpop.permute.xlu1 %1517 }
 0x5c3   : > { %s2001_s30 = scalar_lea.sflag [#allocation4], %s3278_s20 }
 0x5c5   : > { %s2273_s19 = sshll.u32 %s3277_s4, 7 }
 0x5c6   : > { %s2012_s8 = scalar_lea.hbm %s3282_s24, %s2273_s19 }
 0x5cc   : > { %v2535_v61 = vpop.eup %2534 }
 0x5cd   : > { %v1362_v62 = vsel %vm804_vm3, %v2535_v61, 0.0 }
 0x5ce   : > { %1363 = vadd.xlane.f32.xlu0 %v1362_v62 }
 0x5e4   : > { %1367 = vrot.lane.b32.xlu0 %v3009_v12, %s2715_s26 }
 0x657   : > { %v1364_v63 = vpop.xlane.xlu0 %1363 }
 0x658   : > { %2536 = vrcp.f32 %v1364_v63 }
 0x65b   : > { %v1368_v0 = vpop.permute.xlu0 %1367 }
 0x65c   : > { %2370 = vmatpush3.msra.mxu1 %v1368_v0 }
 0x65d   : > { %2379 = vmatprep.subr.mxu1 %v2704_v5 }
 0x665   : > { %v2537_v1 = vpop.eup %2536 }
 0x666   : > { %v1366_v3 = vmul.f32 %v2537_v1, %v2535_v61  ;;  %v2268_v1 = vld [vmem:[%s693_s25] ss:$0 sm:$0xff]  ;;  %s3279_s25 = sld [smem:[#allocation20_spill]] }
 0x668   : > { %2372 = vmatmul.mubr.msk.f32.vlgmr.msra.gmra.mxu1 %vm804_vm3, %v1366_v3 }
 0x669   : > { %2380 = vmatpush3.xpose.msk.msra.mxu1 %vm804_vm3, %v1520_v2  ;;  %2381 = vmatprep.mubr.msk.f32.mxu1 %vm2705_vm1, %v2704_v5 }
 0x66a   : > { %2389 = vmatprep.subr.mxu1 %v2704_v5 }
 0x66c   : > { %2382 = vmatmul.mubr.msk.f32.vlgmr.msra.gmra.mxu1 %vm804_vm3, %v1518_v4  ;;  %p3283_p12 = scmp.ne.s32.totalorder %s3279_s25, 0 }
 0x66d   : > { %2391 = vmatprep.mubr.msk.f32.mxu1 %vm2705_vm1, %v2704_v5  ;;  %2390 = vmatpush3.msra.mxu1 %v800_v20  ;;  %v2271_v20 = vld [vmem:[%s699_s7] ss:$0 sm:$0xff] }
 0x66e   : > { %2405 = vmatprep.subr.mxu1 %v2704_v5  ;;  %p2602_p0 = pnand %p2601_p4, %p3283_p12 }
 0x670   : > { %p2603_p3 = pneg %p2602_p0 }
 0x728   : > { %v1439_v7 = vpop.f32.mrf.mxu1 }
 0x729   : > { %2377 = vmatmul.mubr.msk.f32.vlgmr.msra.gmra.mxu0 %vm804_vm3, %v1439_v7 }
 0x72a   : > { %v2373_v8 = vpop.f32.mrf.mxu1  ;;  %2386 = vmatprep.mubr.msk.f32.mxu0 %vm2705_vm1, %v2704_v5 }
 0x72c   : > { %v1591_v10 = vpop.f32.mrf.mxu1 }
 0x72d   : > { %v1595_v11 = vsel %vm804_vm3, %v1591_v10, -inf }
 0x72e   : > { %1596 = vmax.xlane.f32.xlu0 %v1595_v11  ;;  %v2383_v13 = vpop.f32.mrf.mxu1 }
 0x744   : > { %1606 = vrot.lane.b32.xlu0 %v3009_v12, %s2716_s11 }
 0x7b7   : > { %v1597_v14 = vpop.xlane.xlu0 %1596 }
 0x7b8   : > { %v1598_v15 = vsub.f32 %v1591_v10, %v1597_v14 }
 0x7ba   : > { %v1599_v16 = vmul.f32 1.442695, %v1598_v15 }
 0x7bb   : > { %v1607_v17 = vpop.permute.xlu0 %1606 }
 0x7bc   : > { %2538 = vpow2.f32 %v1599_v16  ;;  %2385 = vmatpush3.msra.mxu0 %v1607_v17 }
 0x7bd   : > { %2394 = vmatprep.subr.mxu0 %v2704_v5 }
 0x7c9   : > { %v2539_v18 = vpop.eup %2538 }
 0x7ca   : > { %v1601_v19 = vsel %vm804_vm3, %v2539_v18, 0.0 }
 0x7cb   : > { %1602 = vadd.xlane.f32.xlu1 %v1601_v19 }
 0x7e9   : > { %v1512_v21 = vpop.f32.mrf.mxu0 }
 0x7ea   : > { %v1516_v22 = vadd.f32 %v1512_v21, %v1275_v53 }
 0x7eb   : > { %v2378_v12 = vpop.f32.mrf.mxu0 }
 0x854   : > { %v1603_v23 = vpop.xlane.xlu1 %1602 }
 0x855   : > { %2540 = vrcp.f32 %v1603_v23 }
 0x862   : > { %v2541_v24 = vpop.eup %2540 }
 0x863   : > { %v1605_v25 = vmul.f32 %v2541_v24, %v2539_v18  ;;  %v2270_v18 = vld [vmem:[%s696_s14] ss:$0 sm:$0xff]  ;;  %s2717_s14 = smov [#allocation7]  }
 0x864   : > { %s2604_s10 = sshll.u32 %s2717_s14, 4  ;;  %s2605_s10 = int_to_ptr.vmem [resolvable:$false] %s2604_s10 }
 0x865   : > { %2387 = vmatmul.mubr.msk.f32.vlgmr.msra.gmra.mxu0 %vm804_vm3, %v1605_v25  ;;  %s2606_s7 = scalar_lea.vmem %s2605_s10, 256  ;;  %p2607_p2 = scmp.lt.s32.totalorder %s2015_s27, %s2605_s10 }
 0x866   : > { %2402 = vmatprep.mubr.msk.f32.mxu0 %vm2705_vm1, %v2704_v5  ;;  %2395 = vmatpush3.msra.mxu0 %v1798_v40  ;;  %p2608_p5 = scmp.lt.s32.totalorder %s2606_s7, %s2600_s15 }
 0x867   : > { %2396 = vmatprep.subr.mxu0 %v2704_v5 }
 0x868   : > { %2397 = vmatpush3.msra.mxu0 %v1797_v41  ;;  %p2609_p7 = por %p2608_p5, %p2607_p2 }
 0x869   : > { %2398 = vmatprep.subr.mxu0 %v2704_v5 }
 0x86a   : > { %p2610_p9 = pnand %p2609_p7, %p2603_p3 }
 0x925   : > { %v1678_v26 = vpop.f32.mrf.mxu0 }
 0x926   : > { %2392 = vmatmul.mubr.msk.f32.vlgmr.msra.gmra.mxu1 %vm804_vm3, %v1678_v26 }
 0x927   : > { %v2388_v27 = vpop.f32.mrf.mxu0  ;;  %2421 = vmatprep.mubr.msk.f32.mxu1 %vm2705_vm1, %v2704_v5  ;;  %2406 = vmatpush3.msra.mxu1 %v1887_v43 }
 0x928   : > { %2407 = vmatprep.subr.mxu1 %v2704_v5 }
 0x929   : > { %2408 = vmatpush3.msra.mxu1 %v1886_v44 }
 0x92a   : > { %2409 = vmatprep.subr.mxu1 %v2704_v5 }
 0x92b   : > { %2410 = vmatpush3.msra.mxu1 %v1885_v45 }
 0x92c   : > { %2411 = vmatprep.subr.mxu1 %v2704_v5 }
 0x92d   : > { %2412 = vmatpush3.msra.mxu1 %v1884_v46 }
 0x92e   : > { %2413 = vmatprep.subr.mxu1 %v2704_v5 }
 0x92f   : > { %2414 = vmatpush3.msra.mxu1 %v1883_v47 }
 0x930   : > { %2415 = vmatprep.subr.mxu1 %v2704_v5 }
 0x931   : > { %2416 = vmatpush3.msra.mxu1 %v1882_v57 }
 0x932   : > { %2417 = vmatprep.subr.mxu1 %v2704_v5 }
 0x933   : > { %2418 = vmatpush3.msra.mxu1 %v1881_v58 }
 0x934   : > { %2419 = vmatprep.subr.mxu1 %v2704_v5 }
 0x935   : > { %2420 = vmatpush3.msra.mxu1 %v1880_v59 }
 0x9e6   : > { %v1751_v28 = vpop.f32.mrf.mxu1 }
 0x9e7   : > { %v1755_v30 = vadd.f32 %v1751_v28, %v1516_v22 }
 0x9e8   : > { %v2393_v31 = vpop.f32.mrf.mxu1 }
 0x9e9   : > { %v1763_v32 = vadd.f32 %v2263_v29, %v1755_v30 }
 0x9eb   : > { %v1764_v33 = vadd.f32 %v1763_v32, %v2996_v9  ;;  %v1796_v9 = vld [vmem:[%s2955_s2 + $0x8] sm:$0xff] }
 0x9ec   : > { %2399 = vmatpush3.msra.mxu0 %v1796_v9 }
 0x9ed   : > { %v1767_v34 = vsel %vm722_vm2, %v1764_v33, 0.0  ;;  %2400 = vmatprep.subr.mxu0 %v2704_v5 }
 0x9ee   : > { %1768 = vadd.xlane.f32.xlu1 %v1767_v34  ;;  %2401 = vmatpush3.msra.mxu0 %v1795_v42 }
 0xa77   : > { %v1769_v35 = vpop.xlane.xlu1 %1768 }
 0xa78   : > { %v1771_v36 = vmul.f32 0.03125, %v1769_v35 }
 0xa7a   : > { %v1772_v37 = vsub.f32 %v1764_v33, %v1771_v36 }
 0xa7c   : > { %v1773_v38 = vmul.f32 %v1772_v37, %v1772_v37 }
 0xa7e   : > { %v1774_v39 = vsel %vm722_vm2, %v1773_v38, 0.0 }
 0xa7f   : > { %1775 = vadd.xlane.f32.xlu1 %v1774_v39 }
 0xb08   : > { %v1776_v48 = vpop.xlane.xlu1 %1775 }
 0xb09   : > { %v1777_v49 = vmul.f32 0.03125, %v1776_v48 }
 0xb0b   : > { %v1778_v50 = vadd.f32 1e-05, %v1777_v49 }
 0xb0d   : > { %2542 = vrsqrt.f32 %v1778_v50 }
 0xb1a   : > { %v2543_v51 = vpop.eup %2542 }
 0xb1b   : > { %v1780_v53 = vmul.f32 %v2543_v51, %v1772_v37 }
 0xb1d   : > { %v1787_v55 = vmul.f32 %v2264_v52, %v1780_v53 }
 0xb1f   : > { %v1794_v56 = vadd.f32 %v2265_v54, %v1787_v55 }
 0xb21   : > { %2403 = vmatmul.mubr.msk.f32.vlgmr.msra.gmra.mxu0 %vm722_vm2, %v1794_v56 }
 0xbe1   : > { %v1875_v61 = vpop.f32.mrf.mxu0 }
 0xbe2   : > { %v1876_v62 = vadd.f32 %v2266_v60, %v1875_v61 }
 0xbe3   : > { %v2404_v63 = vpop.f32.mrf.mxu0 }
 0xbe4   : > { %v1879_v0 = vmax.f32 %v1876_v62, 0.0 }
 0xbe6   : > { %2422 = vmatmul.mubr.msk.f32.vlgmr.msra.gmra.mxu1 %vm1895_vm4, %v1879_v0 }
 0xca6   : > { %v1965_v2 = vpop.f32.mrf.mxu1 }
 0xca7   : > { %v1966_v3 = vadd.f32 %v2268_v1, %v1965_v2 }
 0xca8   : > { %v2423_v5 = vpop.f32.mrf.mxu1 }
 0xca9   : > { %v1969_v4 = vadd.f32 %v1966_v3, %v1794_v56 }
 0xcab   : > { %v1972_v6 = vsel %vm722_vm2, %v1969_v4, 0.0 }
 0xcac   : > { %1973 = vadd.xlane.f32.xlu1 %v1972_v6 }
 0xd35   : > { %v1974_v7 = vpop.xlane.xlu1 %1973 }
 0xd36   : > { %v1975_v8 = vmul.f32 0.03125, %v1974_v7 }
 0xd38   : > { %v1976_v10 = vsub.f32 %v1969_v4, %v1975_v8 }
 0xd3a   : > { %v1977_v11 = vmul.f32 %v1976_v10, %v1976_v10 }
 0xd3c   : > { %v1978_v13 = vsel %vm722_vm2, %v1977_v11, 0.0 }
 0xd3d   : > { %1979 = vadd.xlane.f32.xlu1 %v1978_v13 }
 0xdc6   : > { %v1980_v14 = vpop.xlane.xlu1 %1979 }
 0xdc7   : > { %v1981_v15 = vmul.f32 0.03125, %v1980_v14 }
 0xdc9   : > { %v1982_v16 = vadd.f32 1e-05, %v1981_v15 }
 0xdcb   : > { %2544 = vrsqrt.f32 %v1982_v16 }
 0xdd8   : > { %v2545_v17 = vpop.eup %2544 }
 0xdd9   : > { %v1984_v19 = vmul.f32 %v2545_v17, %v1976_v10 }
 0xddb   : > { %v1991_v21 = vmul.f32 %v2270_v18, %v1984_v19 }
 0xddd   : > { %v1998_v22 = vadd.f32 %v2271_v20, %v1991_v21 }
 0xddf   : > { %1999 = vst.msk [vmem:[%s2979_s17] sm:$0xff] %vm722_vm2, %v1998_v22 }
 0xde0   : > { %2613 = shalt.err (!%p2610_p9)
}
 0xde1   : > { %s2614_s16 = scalar_lea.hbm %s2012_s8, 128  ;;  %s2618_s22 = scalar_lea.hbm %s3282_s24, 256 }
 0xde2   : > { %p2615_p6 = scmp.ne.s32.totalorder %s2012_s8, %s2614_s16  ;;  %p2619_p10 = scmp.lt.s32.totalorder %s2012_s8, %s3282_s24 }
 0xde3   : > { %p2620_p8 = scmp.lt.s32.totalorder %s2618_s22, %s2614_s16 }
 0xde4   : > { %p2616_p11 = pnand %p2615_p6, %p3283_p12 }
 0xde5   : > { %p2621_p1 = por %p2620_p8, %p2619_p10 }
 0xde6   : > { %p2617_p13 = pneg %p2616_p11 }
 0xde8   : > { %p2622_p4 = pnand %p2621_p1, %p2617_p13 }
 0xdea   : > { %2625 = shalt.err (!%p2622_p4)
}
 0xdeb   : > { %2430 = dma.vmem_to_hbm [thread:$0]  (%p3283_p12), %s2015_s27, 128, %s2012_s8, %s2001_s30  }
 0xdec PF: > { %s3284_s23 = sld [smem:[#allocation17_spill]] }
 0xded   : > { %s3285_s4 = sld [smem:[#allocation11_spill]] }
 0xdee   : > { %s3286_s20 = sld [smem:[#allocation18_spill]] }
 0xdf2   : > { %p2447_p0 = scmp.ge.s32.totalorder %s3284_s23, 2 }
 0xdf3   : > { %s2026_s1 = sand.u32 1, %s3285_s4  }
 0xdf4   : > { %p3287_p3 = scmp.ne.s32.totalorder %s3286_s20, 0  ;;  %s2027_s18 = scalar_lea.sflag [#allocation4], %s2026_s1 }
 0xdf6   : > { %p2441_p2 = pnand %p2447_p0, %p3287_p3 }
 0xdf8   : > { %p2442_p5 = pneg %p2441_p2 }
 0xdfa   : > { %2667 = dma.done.wait (%p2442_p5), %s2027_s18, 128  }
 0xdfb   : > { %2669 = vsyncadd (%p2442_p5), %s2027_s18, 4294967168  ;;  %s31_s20 = sadd.s32 1, %s3284_s23   ;;  %s3288_s29 = sld [smem:[#allocation12_spill]] }
 0xdfc   : > { %p28_p7 = scmp.ge.s32.totalorder %s31_s20, 6   ;;  %s3289_s30 = sld [smem:[#allocation13_spill]] }
 0xdfd   : > { %s3290_s15 = sld [smem:[#allocation22_spill]] }
 0xdfe   : > { %s3291_s16 = sld [smem:[#allocation15_spill]]  ;;  %30 = sbr.rel (!%p28_p7) target bundleno = 20 (0x14), region = 165 }
 0xdff   : > { %s3292_s17 = sld [smem:[#allocation16_spill]] }
 0xe00   : > { %s3293_s18 = sld [smem:[#allocation19_spill]] }
 0xe01   : > { %s3294_s19 = sld [smem:[#allocation21_spill]] }
 0xe03   :  { %2032 = vsyncpa [#allocation3], 1 }
 0xe04   :  { %2034 = vsyncpa [#allocation3 + $0x1], 1 }
 0xe05   :  { %2035 = vsyncpa [#allocation6], 1 }
 0xe06   :  { %2036 = vsyncpa [#allocation4], 1 }
 0xe07   :  { %2038 = vsyncpa [#allocation4 + $0x1], 1 }

</bundles_post_ra>
